<compile_context>
chip_gen: v5e
topology: v5e:2x2
jax: 0.10.0
libtpu: 0.0.40
codegen_flags: <defaults>
</compile_context>

<pallas_src>
import jax
import jax.numpy as jnp
from jax.experimental import pallas as pl
from jax.experimental.pallas import tpu as pltpu

NUM_CLASSES = 7      # 6 entity types + "not an entity"
CLASS_PAD = 8        # pad the class axis to a full sublane group
_NEG_BIG = -1e30     # bias for the padded class: never wins max / ~0 in the exp-sum
_INV_SQRT2 = 0.7071067811865476


def _erf(x):
    """Abramowitz & Stegun 7.1.26 erf, |abs err| <= 1.5e-7 (exp + arithmetic only)."""
    p = 0.3275911
    a1, a2, a3, a4, a5 = (0.254829592, -0.284496736, 1.421413741,
                          -1.453152027, 1.061405429)
    ax = jnp.abs(x)
    t = 1.0 / (1.0 + p * ax)
    poly = ((((a5 * t + a4) * t + a3) * t + a2) * t + a1) * t
    y = 1.0 - poly * jnp.exp(-(ax * ax))
    return jnp.where(x < 0.0, -y, y)


def _gelu_exact(x):
    """erf-based GELU matching torch.nn.GELU() (default, non-tanh) to ~1e-7."""
    return 0.5 * x * (1.0 + _erf(x * _INV_SQRT2))


def _entity_detector_kernel(hs_ref, mask_ref,
                            w1_ref, b1_ref, w2t_ref, b2t_ref,
                            g1_ref, gb1_ref, g2_ref, gb2_ref,
                            probs_ref, types_ref, has_ref,
                            accx_ref, cnt_ref):
    s_idx = pl.program_id(1)
    n_s = pl.num_programs(1)

    tb, ts, hdim = hs_ref.shape
    x3 = hs_ref[...]                          # (TB, TILE_S, H), input dtype -> MXU
    x = x3.reshape(tb * ts, hdim)             # merge leading dims (sublane concat)
    mask3 = mask_ref[...]                     # (TB, 1, TILE_S)
    mask_f = mask3.astype(jnp.float32)

    # ---- entity_classifier: Linear -> GELU -> Dropout(eval no-op) -> Linear ----
    h = jnp.dot(x, w1_ref[...], preferred_element_type=jnp.float32) + b1_ref[...]
    h = _gelu_exact(h).astype(w2t_ref.dtype)  # bf16 back into the MXU when enabled
    # TODO(synk): for very large H2, chunk Linear1->GELU->Linear2 over H2 tiles to
    # avoid the full (rows, H2) f32 intermediate; unnecessary at these model sizes.

    # Second Linear "transposed" (classes on sublanes, tokens on lanes) via an NT
    # dot_general: every per-token result comes out lane-dense, no transposes.
    lt = jax.lax.dot_general(w2t_ref[...], h, (((1,), (1,)), ((), ())),
                             preferred_element_type=jnp.float32) + b2t_ref[...]  # (8, TB*TS)

    # P(not-entity) without a full softmax; exact divide keeps the 0.5 threshold
    # faithful to the reference softmax.
    m = jnp.max(lt, axis=0, keepdims=True)
    e = jnp.exp(lt - m)                       # padded class row -> exp(~-1e30) == 0
    denom = jnp.sum(e, axis=0, keepdims=True)
    is_entity = 1.0 - e[6:7, :] / denom       # (1, TB*TS)

    # argmax over the first 6 classes (first occurrence, like torch.argmax), from
    # the unmasked logits exactly as in the PyTorch reference.
    l6 = lt[0:6, :]
    mx = jnp.max(l6, axis=0, keepdims=True)
    cls = jax.lax.broadcasted_iota(jnp.int32, l6.shape, 0).astype(jnp.float32)
    types = jnp.min(jnp.where(l6 >= mx, cls, 6.0), axis=0, keepdims=True)  # (1, TB*TS)

    for b in range(tb):                       # static unroll; TB is small
        sl = slice(b * ts, (b + 1) * ts)
        probs_ref[b] = is_entity[:, sl] * mask_f[b]
        types_ref[b] = types[:, sl].astype(jnp.int32)

    # ---- masked running sum over the sequence (for the global head) ----
    @pl.when(s_idx == 0)
    def _init():
        accx_ref[...] = jnp.zeros_like(accx_ref)
        cnt_ref[...] = jnp.zeros_like(cnt_ref)

    # per-row mask @ x : (TB,1,S) x (TB,S,H) -> (TB,1,H); no (B,S,H) temporary.
    accx_ref[...] += jax.lax.dot_general(mask3.astype(x3.dtype), x3,
                                         (((2,), (1,)), ((0,), (0,))),
                                         preferred_element_type=jnp.float32)
    cnt_ref[...] += jnp.sum(mask_f, axis=2, keepdims=True)

    # ---- finalize: global_entity_detector Linear -> ReLU -> Linear ----
    #      (Sigmoid folded into a `logit > 0` test in the wrapper.)
    @pl.when(s_idx == n_s - 1)
    def _finalize():
        for b in range(tb):
            seq_len = jnp.maximum(cnt_ref[b], 1.0)             # (1, 1)
            avg = accx_ref[b] / seq_len                        # (1, H)
            g = jnp.dot(avg, g1_ref[...],
                        preferred_element_type=jnp.float32) + gb1_ref[...]
            g = jnp.maximum(g, 0.0)
            z = jnp.dot(g, g2_ref[...],
                        preferred_element_type=jnp.float32) + gb2_ref[...]
            has_ref[b] = z                                     # (1, 1) pre-sigmoid logit


def _round_up(n, m):
    return ((n + m - 1) // m) * m


def _cdiv(a, b):
    return -(-a // b)


def _vmem_capacity_bytes():
    try:
        cap = getattr(pltpu.get_tpu_info(), "vmem_capacity_bytes", None)
        if cap:
            return int(cap)
    except Exception:
        pass
    return 64 * 1024 * 1024        # conservative fallback (v7x has the smallest VMEM)


def entity_detector_forward(params, hidden_states, attention_mask=None):
    """Pallas forward pass; returns the same dict as EntityDetector.forward (eval)."""
    B, S, H = hidden_states.shape
    H2 = params['w1'].shape[1]

    if attention_mask is None:
        attention_mask = jnp.ones((B, S), hidden_states.dtype)

    in_itemsize = jnp.dtype(hidden_states.dtype).itemsize
    # Feed the MXU bf16 operands when the activations are bf16 (f32 accumulation).
    mxu_dtype = jnp.bfloat16 if hidden_states.dtype == jnp.bfloat16 else params['w1'].dtype
    mxu_itemsize = jnp.dtype(mxu_dtype).itemsize

    w1 = params['w1'].astype(mxu_dtype)
    b1 = params['b1'].astype(jnp.float32)
    # Pre-transpose + pad the second classifier Linear (classes on rows); the padded
    # class gets a -1e30 bias so it never wins the argmax nor contributes to exp-sum.
    w2t = jnp.zeros((CLASS_PAD, H2), mxu_dtype).at[:NUM_CLASSES].set(
        params['w2'].T.astype(mxu_dtype))
    b2t = jnp.full((CLASS_PAD, 1), _NEG_BIG, jnp.float32).at[:NUM_CLASSES].set(
        params['b2'].reshape(NUM_CLASSES, 1).astype(jnp.float32))
    g1 = params['g1'].astype(jnp.float32)
    gb1 = params['gb1'].astype(jnp.float32)
    g2 = params['g2'].astype(jnp.float32)
    gb2 = params['gb2'].astype(jnp.float32)
    weights = (w1, b1, w2t, b2t, g1, gb1, g2, gb2)

    # ---------------- VMEM budget -> tile plan ----------------
    vmem_cap = _vmem_capacity_bytes()
    plan_cap = (vmem_cap * 3) // 4                  # leave headroom for the compiler
    # Resident weights are still double-buffered by the pipeline (constant index_map).
    weight_bytes = 2 * sum(int(w.size) * jnp.dtype(w.dtype).itemsize for w in weights)
    # VMEM cost per token row processed in one grid step.
    per_row = (2 * H * in_itemsize                  # hidden block, double-buffered
               + 2 * in_itemsize                    # mask block, double-buffered
               + H2 * 4 + H2 * mxu_itemsize         # f32 GELU intermediate + MXU copy
               + CLASS_PAD * 4 * 2                  # logits + exp
               + 2 * (4 + 4))                       # prob/type output blocks (x2 bufs)
    avail = plan_cap - weight_bytes - (1 << 20)     # 1 MiB slack: scratch / spills
    max_rows = max(128, (avail // per_row) // 128 * 128) if avail > 0 else 128
    rows_cap = min(max_rows, 1024)                  # step-overhead amortization cap

    tile_s = min(_round_up(max(S, 1), 128), rows_cap)   # lane-dense outputs: x128
    n_s_tiles = _cdiv(S, tile_s)
    s_pad = n_s_tiles * tile_s

    # Block several batch rows per step for short sequences, but keep >= 2 batch grid
    # steps when possible so megacore (v7x) still splits the (parallel) batch axis.
    tb_max = max(1, rows_cap // tile_s)
    TB = min(tb_max, _cdiv(B, 2)) if B >= 2 else 1
    B_pad = _round_up(B, TB)

    if s_pad != S or B_pad != B:
        hidden_states = jnp.pad(hidden_states,
                                ((0, B_pad - B), (0, s_pad - S), (0, 0)))
        attention_mask = jnp.pad(attention_mask, ((0, B_pad - B), (0, s_pad - S)))
    mask3 = attention_mask.reshape(B_pad, 1, s_pad).astype(hidden_states.dtype)

    plan_bytes = weight_bytes + TB * tile_s * per_row + (2 << 20)
    vmem_limit = int(min(max(plan_bytes + (4 << 20), 32 << 20), (vmem_cap * 9) // 10))

    def full_spec(arr):
        return pl.BlockSpec(arr.shape, lambda b, s: (0,) * arr.ndim)

    in_specs = [
        pl.BlockSpec((TB, tile_s, H), lambda b, s: (b, s, 0)),   # hidden_states
        pl.BlockSpec((TB, 1, tile_s), lambda b, s: (b, 0, s)),   # attention mask
    ] + [full_spec(w) for w in weights]
    out_specs = [
        pl.BlockSpec((TB, 1, tile_s), lambda b, s: (b, 0, s)),   # is_entity prob (f32)
        pl.BlockSpec((TB, 1, tile_s), lambda b, s: (b, 0, s)),   # entity type (i32)
        pl.BlockSpec((TB, 1, 1), lambda b, s: (b, 0, 0)),        # has_entities logit
    ]
    out_shape = (
        jax.ShapeDtypeStruct((B_pad, 1, s_pad), jnp.float32),
        jax.ShapeDtypeStruct((B_pad, 1, s_pad), jnp.int32),
        jax.ShapeDtypeStruct((B_pad, 1, 1), jnp.float32),
    )

    probs, types, has_logit = pl.pallas_call(
        _entity_detector_kernel,
        out_shape=out_shape,
        grid_spec=pltpu.PrefetchScalarGridSpec(
            num_scalar_prefetch=0,
            grid=(B_pad // TB, n_s_tiles),
            in_specs=in_specs,
            out_specs=out_specs,
            scratch_shapes=[pltpu.VMEM((TB, 1, H), jnp.float32),   # sum_s mask * x
                            pltpu.VMEM((TB, 1, 1), jnp.float32)],  # sum_s mask
        ),
        compiler_params=pltpu.CompilerParams(
            dimension_semantics=("parallel", "arbitrary"),
            vmem_limit_bytes=vmem_limit),
    )(hidden_states, mask3, *weights)

    probs = probs.reshape(B_pad, s_pad)[:B, :S]
    types = types.reshape(B_pad, s_pad)[:B, :S]
    has_logit = has_logit.reshape(B_pad, 1)[:B]
    return {
        'has_entities': has_logit > 0.0,          # == sigmoid(logit) > 0.5
        'entity_positions': probs > 0.5,
        'entity_types': types,
        'entity_probs': probs[:, :, None],
    }


if __name__ == "__main__":
    B, S, H = 2, 8, 32
    key = jax.random.PRNGKey(0)
    ks = jax.random.split(key, 10)

    # Deterministic synthetic parameters (nn.Linear weights stored [in, out]).
    params = {
        'w1': jax.random.normal(ks[0], (H, H // 2), jnp.float32) * 0.05,
        'b1': jax.random.normal(ks[1], (1, H // 2), jnp.float32) * 0.05,
        'w2': jax.random.normal(ks[2], (H // 2, 7), jnp.float32) * 0.05,
        'b2': jax.random.normal(ks[3], (1, 7), jnp.float32) * 0.05,
        'g1': jax.random.normal(ks[4], (H, H // 4), jnp.float32) * 0.05,
        'gb1': jax.random.normal(ks[5], (1, H // 4), jnp.float32) * 0.05,
        'g2': jax.random.normal(ks[6], (H // 4, 1), jnp.float32) * 0.05,
        'gb2': jax.random.normal(ks[7], (1, 1), jnp.float32) * 0.05,
    }

    hidden_states = jax.random.normal(ks[8], (B, S, H), jnp.float32)
    # last two tokens of each sequence are padding
    attention_mask = jnp.concatenate(
        [jnp.ones((B, S - 2), jnp.float32), jnp.zeros((B, 2), jnp.float32)], axis=1)

    out = entity_detector_forward(params, hidden_states, attention_mask)
    jax.block_until_ready(out)

    # Pure-JAX reference of the PyTorch forward (eval mode).
    x = hidden_states
    h = jax.nn.gelu(x @ params['w1'] + params['b1'], approximate=False)
    logits = h @ params['w2'] + params['b2']
    ref_probs = (1.0 - jax.nn.softmax(logits, axis=-1)[:, :, 6]) * attention_mask
    ref_types = jnp.argmax(logits[:, :, :6], axis=-1).astype(jnp.int32)
    masked = x * attention_mask[:, :, None]
    avg = masked.sum(axis=1) / jnp.maximum(attention_mask.sum(axis=1, keepdims=True), 1.0)
    ref_has = (jnp.maximum(avg @ params['g1'] + params['gb1'], 0.0) @ params['g2']
               + params['gb2']) > 0.0

    assert out['has_entities'].shape == (B, 1) and out['has_entities'].dtype == jnp.bool_
    assert out['entity_positions'].shape == (B, S) and out['entity_positions'].dtype == jnp.bool_
    assert out['entity_types'].shape == (B, S) and out['entity_types'].dtype == jnp.int32
    assert out['entity_probs'].shape == (B, S, 1) and out['entity_probs'].dtype == jnp.float32
    assert jnp.allclose(out['entity_probs'][:, :, 0], ref_probs, atol=5e-3)
    assert bool(jnp.all(out['entity_types'] == ref_types))
    assert bool(jnp.all(out['entity_positions'] == (ref_probs > 0.5)))
    assert bool(jnp.all(out['has_entities'] == ref_has))
    print("KERNEL_OK")
</pallas_src>

<mosaic_0001>
module attributes {stable_mosaic.version = 11 : i64} {
  func.func @_entity_detector_kernel(%arg0: i32, %arg1: i32, %arg2: memref<1x128x32xf32, #tpu.memory_space<vmem>>, %arg3: memref<1x1x128xf32, #tpu.memory_space<vmem>>, %arg4: memref<32x16xf32, #tpu.memory_space<vmem>>, %arg5: memref<1x16xf32, #tpu.memory_space<vmem>>, %arg6: memref<8x16xf32, #tpu.memory_space<vmem>>, %arg7: memref<8x1xf32, #tpu.memory_space<vmem>>, %arg8: memref<32x8xf32, #tpu.memory_space<vmem>>, %arg9: memref<1x8xf32, #tpu.memory_space<vmem>>, %arg10: memref<8x1xf32, #tpu.memory_space<vmem>>, %arg11: memref<1x1xf32, #tpu.memory_space<vmem>>, %arg12: memref<1x1x128xf32, #tpu.memory_space<vmem>>, %arg13: memref<1x1x128xi32, #tpu.memory_space<vmem>>, %arg14: memref<1x1x1xf32, #tpu.memory_space<vmem>>, %arg15: memref<1x1x32xf32, #tpu.memory_space<vmem>>, %arg16: memref<1x1x1xf32, #tpu.memory_space<vmem>>) attributes {dimension_semantics = [#tpu.dimension_semantics<parallel>, #tpu.dimension_semantics<arbitrary>], iteration_bounds = array<i64: 2, 1>, scalar_prefetch = 0 : i64, scratch_operands = 2 : i64, tpu.core_type = #tpu.core_type<tc>, window_params = [{transform_indices = @transform_0, window_bounds = array<i64: 1, 128, 32>}, {transform_indices = @transform_1, window_bounds = array<i64: 1, 1, 128>}, {pipeline_mode = #tpu.pipeline_mode<synchronous>, transform_indices = @transform_2, window_bounds = array<i64: 32, 16>}, {pipeline_mode = #tpu.pipeline_mode<synchronous>, transform_indices = @transform_3, window_bounds = array<i64: 1, 16>}, {pipeline_mode = #tpu.pipeline_mode<synchronous>, transform_indices = @transform_4, window_bounds = array<i64: 8, 16>}, {pipeline_mode = #tpu.pipeline_mode<synchronous>, transform_indices = @transform_5, window_bounds = array<i64: 8, 1>}, {pipeline_mode = #tpu.pipeline_mode<synchronous>, transform_indices = @transform_6, window_bounds = array<i64: 32, 8>}, {pipeline_mode = #tpu.pipeline_mode<synchronous>, transform_indices = @transform_7, window_bounds = array<i64: 1, 8>}, {pipeline_mode = #tpu.pipeline_mode<synchronous>, transform_indices = @transform_8, window_bounds = array<i64: 8, 1>}, {pipeline_mode = #tpu.pipeline_mode<synchronous>, transform_indices = @transform_9, window_bounds = array<i64: 1, 1>}, {transform_indices = @transform_10, window_bounds = array<i64: 1, 1, 128>}, {transform_indices = @transform_11, window_bounds = array<i64: 1, 1, 128>}, {transform_indices = @transform_12, window_bounds = array<i64: 1, 1, 1>}]} {
    %c0 = arith.constant 0 : index
    %c0_0 = arith.constant 0 : index
    %c0_1 = arith.constant 0 : index
    %0 = vector.load %arg2[%c0, %c0_0, %c0_1] : memref<1x128x32xf32, #tpu.memory_space<vmem>>, vector<1x128x32xf32>
    %1 = vector.shape_cast %0 : vector<1x128x32xf32> to vector<128x32xf32>
    %c0_2 = arith.constant 0 : index
    %c0_3 = arith.constant 0 : index
    %c0_4 = arith.constant 0 : index
    %2 = vector.load %arg3[%c0_2, %c0_3, %c0_4] : memref<1x1x128xf32, #tpu.memory_space<vmem>>, vector<1x1x128xf32>
    %c0_5 = arith.constant 0 : index
    %c0_6 = arith.constant 0 : index
    %3 = vector.load %arg4[%c0_5, %c0_6] : memref<32x16xf32, #tpu.memory_space<vmem>>, vector<32x16xf32>
    %cst = arith.constant dense<0.000000e+00> : vector<128x16xf32>
    %4 = tpu.matmul %1, %3, %cst {dimension_numbers = #tpu.dot_dimension_numbers<[1], [0], [0], [1], [0, 0, 1, 1], [], []>} : vector<128x32xf32>, vector<32x16xf32>, vector<128x16xf32> -> vector<128x16xf32>
    %c0_7 = arith.constant 0 : index
    %c0_8 = arith.constant 0 : index
    %5 = vector.load %arg5[%c0_7, %c0_8] : memref<1x16xf32, #tpu.memory_space<vmem>>, vector<1x16xf32>
    %6 = vector.broadcast %5 : vector<1x16xf32> to vector<128x16xf32>
    %7 = arith.addf %4, %6 : vector<128x16xf32>
    %cst_9 = arith.constant 5.000000e-01 : f32
    %8 = vector.broadcast %cst_9 : f32 to vector<128x16xf32>
    %9 = arith.mulf %8, %7 : vector<128x16xf32>
    %cst_10 = arith.constant 0.707106769 : f32
    %10 = vector.broadcast %cst_10 : f32 to vector<128x16xf32>
    %11 = arith.mulf %7, %10 : vector<128x16xf32>
    %12 = math.absf %11 : vector<128x16xf32>
    %cst_11 = arith.constant 0.327591091 : f32
    %13 = vector.broadcast %cst_11 : f32 to vector<128x16xf32>
    %14 = arith.mulf %13, %12 : vector<128x16xf32>
    %cst_12 = arith.constant 1.000000e+00 : f32
    %15 = vector.broadcast %cst_12 : f32 to vector<128x16xf32>
    %16 = arith.addf %15, %14 : vector<128x16xf32>
    %cst_13 = arith.constant 1.000000e+00 : f32
    %17 = vector.broadcast %cst_13 : f32 to vector<128x16xf32>
    %18 = arith.divf %17, %16 : vector<128x16xf32>
    %cst_14 = arith.constant 1.06140542 : f32
    %19 = vector.broadcast %cst_14 : f32 to vector<128x16xf32>
    %20 = arith.mulf %19, %18 : vector<128x16xf32>
    %cst_15 = arith.constant -1.45315206 : f32
    %21 = vector.broadcast %cst_15 : f32 to vector<128x16xf32>
    %22 = arith.addf %20, %21 : vector<128x16xf32>
    %23 = arith.mulf %22, %18 : vector<128x16xf32>
    %cst_16 = arith.constant 1.42141378 : f32
    %24 = vector.broadcast %cst_16 : f32 to vector<128x16xf32>
    %25 = arith.addf %23, %24 : vector<128x16xf32>
    %26 = arith.mulf %25, %18 : vector<128x16xf32>
    %cst_17 = arith.constant -0.284496725 : f32
    %27 = vector.broadcast %cst_17 : f32 to vector<128x16xf32>
    %28 = arith.addf %26, %27 : vector<128x16xf32>
    %29 = arith.mulf %28, %18 : vector<128x16xf32>
    %cst_18 = arith.constant 0.254829586 : f32
    %30 = vector.broadcast %cst_18 : f32 to vector<128x16xf32>
    %31 = arith.addf %29, %30 : vector<128x16xf32>
    %32 = arith.mulf %31, %18 : vector<128x16xf32>
    %33 = arith.mulf %12, %12 : vector<128x16xf32>
    %cst_19 = arith.constant 0.000000e+00 : f32
    %34 = vector.broadcast %cst_19 : f32 to vector<128x16xf32>
    %35 = arith.subf %34, %33 : vector<128x16xf32>
    %36 = math.exp %35 : vector<128x16xf32>
    %37 = arith.mulf %32, %36 : vector<128x16xf32>
    %cst_20 = arith.constant 1.000000e+00 : f32
    %38 = vector.broadcast %cst_20 : f32 to vector<128x16xf32>
    %39 = arith.subf %38, %37 : vector<128x16xf32>
    %cst_21 = arith.constant 0.000000e+00 : f32
    %40 = vector.broadcast %cst_21 : f32 to vector<128x16xf32>
    %41 = arith.cmpf olt, %11, %40 : vector<128x16xf32>
    %cst_22 = arith.constant 0.000000e+00 : f32
    %42 = vector.broadcast %cst_22 : f32 to vector<128x16xf32>
    %43 = arith.subf %42, %39 : vector<128x16xf32>
    %44 = arith.select %41, %43, %39 : vector<128x16xi1>, vector<128x16xf32>
    %cst_23 = arith.constant 1.000000e+00 : f32
    %45 = vector.broadcast %cst_23 : f32 to vector<128x16xf32>
    %46 = arith.addf %45, %44 : vector<128x16xf32>
    %47 = arith.mulf %9, %46 : vector<128x16xf32>
    %c0_24 = arith.constant 0 : index
    %c0_25 = arith.constant 0 : index
    %48 = vector.load %arg6[%c0_24, %c0_25] : memref<8x16xf32, #tpu.memory_space<vmem>>, vector<8x16xf32>
    %cst_26 = arith.constant dense<0.000000e+00> : vector<8x128xf32>
    %49 = tpu.matmul %48, %47, %cst_26 {dimension_numbers = #tpu.dot_dimension_numbers<[1], [1], [0], [0], [0, 0, 1, 0], [], []>} : vector<8x16xf32>, vector<128x16xf32>, vector<8x128xf32> -> vector<8x128xf32>
    %c0_27 = arith.constant 0 : index
    %c0_28 = arith.constant 0 : index
    %50 = vector.load %arg7[%c0_27, %c0_28] : memref<8x1xf32, #tpu.memory_space<vmem>>, vector<8x1xf32>
    %51 = vector.broadcast %50 : vector<8x1xf32> to vector<8x128xf32>
    %52 = arith.addf %49, %51 : vector<8x128xf32>
    %cst_29 = arith.constant dense<0xFF800000> : vector<128xf32>
    %53 = vector.multi_reduction <maximumf>, %52, %cst_29 [0] : vector<8x128xf32> to vector<128xf32>
    %54 = vector.shape_cast %53 : vector<128xf32> to vector<1x128xf32>
    %55 = vector.broadcast %54 : vector<1x128xf32> to vector<8x128xf32>
    %56 = arith.subf %52, %55 : vector<8x128xf32>
    %57 = math.exp %56 : vector<8x128xf32>
    %cst_30 = arith.constant dense<0.000000e+00> : vector<128xf32>
    %58 = vector.multi_reduction <add>, %57, %cst_30 [0] : vector<8x128xf32> to vector<128xf32>
    %59 = vector.shape_cast %58 : vector<128xf32> to vector<1x128xf32>
    %60 = vector.extract_strided_slice %57 {offsets = [6, 0], sizes = [1, 128], strides = [1, 1]} : vector<8x128xf32> to vector<1x128xf32>
    %61 = arith.divf %60, %59 : vector<1x128xf32>
    %cst_31 = arith.constant 1.000000e+00 : f32
    %62 = vector.broadcast %cst_31 : f32 to vector<1x128xf32>
    %63 = arith.subf %62, %61 : vector<1x128xf32>
    %64 = vector.extract_strided_slice %52 {offsets = [0, 0], sizes = [6, 128], strides = [1, 1]} : vector<8x128xf32> to vector<6x128xf32>
    %cst_32 = arith.constant dense<0xFF800000> : vector<128xf32>
    %65 = vector.multi_reduction <maximumf>, %64, %cst_32 [0] : vector<6x128xf32> to vector<128xf32>
    %66 = vector.shape_cast %65 : vector<128xf32> to vector<1x128xf32>
    %67 = tpu.iota {dimensions = array<i32: 0>} : vector<6x128xi32>
    %68 = arith.sitofp %67 : vector<6x128xi32> to vector<6x128xf32>
    %69 = vector.broadcast %66 : vector<1x128xf32> to vector<6x128xf32>
    %70 = arith.cmpf oge, %64, %69 : vector<6x128xf32>
    %cst_33 = arith.constant 6.000000e+00 : f32
    %71 = vector.broadcast %cst_33 : f32 to vector<6x128xf32>
    %72 = arith.select %70, %68, %71 : vector<6x128xi1>, vector<6x128xf32>
    %cst_34 = arith.constant dense<0x7F800000> : vector<128xf32>
    %73 = vector.multi_reduction <minimumf>, %72, %cst_34 [0] : vector<6x128xf32> to vector<128xf32>
    %74 = vector.shape_cast %73 : vector<128xf32> to vector<1x128xf32>
    %75 = vector.shape_cast %2 : vector<1x1x128xf32> to vector<1x128xf32>
    %76 = arith.mulf %63, %75 : vector<1x128xf32>
    %c0_35 = arith.constant 0 : index
    %c0_36 = arith.constant 0 : index
    %c0_37 = arith.constant 0 : index
    %77 = vector.load %arg12[%c0_35, %c0_36, %c0_37] : memref<1x1x128xf32, #tpu.memory_space<vmem>>, vector<1x1x128xf32>
    %78 = vector.shape_cast %77 : vector<1x1x128xf32> to vector<1x128xf32>
    %79 = vector.shape_cast %76 : vector<1x128xf32> to vector<1x1x128xf32>
    tpu.vector_store %arg12[%c0_35, %c0_36, %c0_37], %79 {strides = array<i32>} : memref<1x1x128xf32, #tpu.memory_space<vmem>>, vector<1x1x128xf32>,
    %80 = arith.fptosi %74 : vector<1x128xf32> to vector<1x128xi32>
    %c0_38 = arith.constant 0 : index
    %c0_39 = arith.constant 0 : index
    %c0_40 = arith.constant 0 : index
    %81 = vector.load %arg13[%c0_38, %c0_39, %c0_40] : memref<1x1x128xi32, #tpu.memory_space<vmem>>, vector<1x1x128xi32>
    %82 = vector.shape_cast %81 : vector<1x1x128xi32> to vector<1x128xi32>
    %83 = vector.shape_cast %80 : vector<1x128xi32> to vector<1x1x128xi32>
    tpu.vector_store %arg13[%c0_38, %c0_39, %c0_40], %83 {strides = array<i32>} : memref<1x1x128xi32, #tpu.memory_space<vmem>>, vector<1x1x128xi32>,
    %c0_i32 = arith.constant 0 : i32
    %84 = arith.cmpi eq, %arg1, %c0_i32 : i32
    %85 = arith.extui %84 : i1 to i32
    %c0_i32_41 = arith.constant 0 : i32
    %86 = arith.cmpi ne, %85, %c0_i32_41 : i32
    scf.if %86 {
      %cst_58 = arith.constant 0.000000e+00 : f32
      %99 = vector.broadcast %cst_58 : f32 to vector<1x1x32xf32>
      %c0_59 = arith.constant 0 : index
      %c0_60 = arith.constant 0 : index
      %c0_61 = arith.constant 0 : index
      %100 = vector.load %arg15[%c0_59, %c0_60, %c0_61] : memref<1x1x32xf32, #tpu.memory_space<vmem>>, vector<1x1x32xf32>
      tpu.vector_store %arg15[%c0_59, %c0_60, %c0_61], %99 {strides = array<i32>} : memref<1x1x32xf32, #tpu.memory_space<vmem>>, vector<1x1x32xf32>,
      %cst_62 = arith.constant 0.000000e+00 : f32
      %101 = vector.broadcast %cst_62 : f32 to vector<1x1x1xf32>
      %c0_63 = arith.constant 0 : index
      %c0_64 = arith.constant 0 : index
      %c0_65 = arith.constant 0 : index
      %102 = vector.load %arg16[%c0_63, %c0_64, %c0_65] : memref<1x1x1xf32, #tpu.memory_space<vmem>>, vector<1x1x1xf32>
      tpu.vector_store %arg16[%c0_63, %c0_64, %c0_65], %101 {strides = array<i32>} : memref<1x1x1xf32, #tpu.memory_space<vmem>>, vector<1x1x1xf32>,
    } else {
    }
    %c0_42 = arith.constant 0 : index
    %c0_43 = arith.constant 0 : index
    %c0_44 = arith.constant 0 : index
    %87 = vector.load %arg15[%c0_42, %c0_43, %c0_44] : memref<1x1x32xf32, #tpu.memory_space<vmem>>, vector<1x1x32xf32>
    %cst_45 = arith.constant dense<0.000000e+00> : vector<1x1x32xf32>
    %88 = tpu.matmul %2, %0, %cst_45 {dimension_numbers = #tpu.dot_dimension_numbers<[2], [1], [1], [2], [0, 0, 0, 1, 1, 2], [0], [0]>} : vector<1x1x128xf32>, vector<1x128x32xf32>, vector<1x1x32xf32> -> vector<1x1x32xf32>
    %89 = arith.addf %87, %88 : vector<1x1x32xf32>
    %c0_46 = arith.constant 0 : index
    %c0_47 = arith.constant 0 : index
    %c0_48 = arith.constant 0 : index
    %90 = vector.load %arg15[%c0_46, %c0_47, %c0_48] : memref<1x1x32xf32, #tpu.memory_space<vmem>>, vector<1x1x32xf32>
    tpu.vector_store %arg15[%c0_46, %c0_47, %c0_48], %89 {strides = array<i32>} : memref<1x1x32xf32, #tpu.memory_space<vmem>>, vector<1x1x32xf32>,
    %c0_49 = arith.constant 0 : index
    %c0_50 = arith.constant 0 : index
    %c0_51 = arith.constant 0 : index
    %91 = vector.load %arg16[%c0_49, %c0_50, %c0_51] : memref<1x1x1xf32, #tpu.memory_space<vmem>>, vector<1x1x1xf32>
    %cst_52 = arith.constant dense<0.000000e+00> : vector<1x1xf32>
    %92 = vector.multi_reduction <add>, %2, %cst_52 [2] : vector<1x1x128xf32> to vector<1x1xf32>
    %93 = vector.shape_cast %92 : vector<1x1xf32> to vector<1x1x1xf32>
    %94 = arith.addf %91, %93 : vector<1x1x1xf32>
    %c0_53 = arith.constant 0 : index
    %c0_54 = arith.constant 0 : index
    %c0_55 = arith.constant 0 : index
    %95 = vector.load %arg16[%c0_53, %c0_54, %c0_55] : memref<1x1x1xf32, #tpu.memory_space<vmem>>, vector<1x1x1xf32>
    tpu.vector_store %arg16[%c0_53, %c0_54, %c0_55], %94 {strides = array<i32>} : memref<1x1x1xf32, #tpu.memory_space<vmem>>, vector<1x1x1xf32>,
    %c0_i32_56 = arith.constant 0 : i32
    %96 = arith.cmpi eq, %arg1, %c0_i32_56 : i32
    %97 = arith.extui %96 : i1 to i32
    %c0_i32_57 = arith.constant 0 : i32
    %98 = arith.cmpi ne, %97, %c0_i32_57 : i32
    scf.if %98 {
      %c0_58 = arith.constant 0 : index
      %c0_59 = arith.constant 0 : index
      %c0_60 = arith.constant 0 : index
      %99 = vector.load %arg16[%c0_58, %c0_59, %c0_60] : memref<1x1x1xf32, #tpu.memory_space<vmem>>, vector<1x1x1xf32>
      %100 = vector.shape_cast %99 : vector<1x1x1xf32> to vector<1x1xf32>
      %cst_61 = arith.constant 1.000000e+00 : f32
      %101 = vector.broadcast %cst_61 : f32 to vector<1x1xf32>
      %102 = arith.maximumf %100, %101 : vector<1x1xf32>
      %c0_62 = arith.constant 0 : index
      %c0_63 = arith.constant 0 : index
      %c0_64 = arith.constant 0 : index
      %103 = vector.load %arg15[%c0_62, %c0_63, %c0_64] : memref<1x1x32xf32, #tpu.memory_space<vmem>>, vector<1x1x32xf32>
      %104 = vector.shape_cast %103 : vector<1x1x32xf32> to vector<1x32xf32>
      %105 = vector.broadcast %102 : vector<1x1xf32> to vector<1x32xf32>
      %106 = arith.divf %104, %105 : vector<1x32xf32>
      %c0_65 = arith.constant 0 : index
      %c0_66 = arith.constant 0 : index
      %107 = vector.load %arg8[%c0_65, %c0_66] : memref<32x8xf32, #tpu.memory_space<vmem>>, vector<32x8xf32>
      %cst_67 = arith.constant dense<0.000000e+00> : vector<1x8xf32>
      %108 = tpu.matmul %106, %107, %cst_67 {dimension_numbers = #tpu.dot_dimension_numbers<[1], [0], [0], [1], [0, 0, 1, 1], [], []>} : vector<1x32xf32>, vector<32x8xf32>, vector<1x8xf32> -> vector<1x8xf32>
      %c0_68 = arith.constant 0 : index
      %c0_69 = arith.constant 0 : index
      %109 = vector.load %arg9[%c0_68, %c0_69] : memref<1x8xf32, #tpu.memory_space<vmem>>, vector<1x8xf32>
      %110 = arith.addf %108, %109 : vector<1x8xf32>
      %cst_70 = arith.constant 0.000000e+00 : f32
      %111 = vector.broadcast %cst_70 : f32 to vector<1x8xf32>
      %112 = arith.maximumf %110, %111 : vector<1x8xf32>
      %c0_71 = arith.constant 0 : index
      %c0_72 = arith.constant 0 : index
      %113 = vector.load %arg10[%c0_71, %c0_72] : memref<8x1xf32, #tpu.memory_space<vmem>>, vector<8x1xf32>
      %cst_73 = arith.constant dense<0.000000e+00> : vector<1x1xf32>
      %114 = tpu.matmul %112, %113, %cst_73 {dimension_numbers = #tpu.dot_dimension_numbers<[1], [0], [0], [1], [0, 0, 1, 1], [], []>} : vector<1x8xf32>, vector<8x1xf32>, vector<1x1xf32> -> vector<1x1xf32>
      %c0_74 = arith.constant 0 : index
      %c0_75 = arith.constant 0 : index
      %115 = vector.load %arg11[%c0_74, %c0_75] : memref<1x1xf32, #tpu.memory_space<vmem>>, vector<1x1xf32>
      %116 = arith.addf %114, %115 : vector<1x1xf32>
      %c0_76 = arith.constant 0 : index
      %c0_77 = arith.constant 0 : index
      %c0_78 = arith.constant 0 : index
      %117 = vector.load %arg14[%c0_76, %c0_77, %c0_78] : memref<1x1x1xf32, #tpu.memory_space<vmem>>, vector<1x1x1xf32>
      %118 = vector.shape_cast %117 : vector<1x1x1xf32> to vector<1x1xf32>
      %119 = vector.shape_cast %116 : vector<1x1xf32> to vector<1x1x1xf32>
      tpu.vector_store %arg14[%c0_76, %c0_77, %c0_78], %119 {strides = array<i32>} : memref<1x1x1xf32, #tpu.memory_space<vmem>>, vector<1x1x1xf32>,
    } else {
    }
    return
  }
  func.func @transform_0(%arg0: i32, %arg1: i32) -> (i32, i32, i32) {
    %c0_i32 = arith.constant 0 : i32
    %c0_i32_0 = arith.constant 0 : i32
    return %arg0, %arg1, %c0_i32 : i32, i32, i32
  }
  func.func @transform_1(%arg0: i32, %arg1: i32) -> (i32, i32, i32) {
    %c0_i32 = arith.constant 0 : i32
    %c0_i32_0 = arith.constant 0 : i32
    return %arg0, %c0_i32, %arg1 : i32, i32, i32
  }
  func.func @transform_2(%arg0: i32, %arg1: i32) -> (i32, i32) {
    %c0_i32 = arith.constant 0 : i32
    %c0_i32_0 = arith.constant 0 : i32
    %c0_i32_1 = arith.constant 0 : i32
    return %c0_i32, %c0_i32_0 : i32, i32
  }
  func.func @transform_3(%arg0: i32, %arg1: i32) -> (i32, i32) {
    %c0_i32 = arith.constant 0 : i32
    %c0_i32_0 = arith.constant 0 : i32
    %c0_i32_1 = arith.constant 0 : i32
    return %c0_i32, %c0_i32_0 : i32, i32
  }
  func.func @transform_4(%arg0: i32, %arg1: i32) -> (i32, i32) {
    %c0_i32 = arith.constant 0 : i32
    %c0_i32_0 = arith.constant 0 : i32
    %c0_i32_1 = arith.constant 0 : i32
    return %c0_i32, %c0_i32_0 : i32, i32
  }
  func.func @transform_5(%arg0: i32, %arg1: i32) -> (i32, i32) {
    %c0_i32 = arith.constant 0 : i32
    %c0_i32_0 = arith.constant 0 : i32
    %c0_i32_1 = arith.constant 0 : i32
    return %c0_i32, %c0_i32_0 : i32, i32
  }
  func.func @transform_6(%arg0: i32, %arg1: i32) -> (i32, i32) {
    %c0_i32 = arith.constant 0 : i32
    %c0_i32_0 = arith.constant 0 : i32
    %c0_i32_1 = arith.constant 0 : i32
    return %c0_i32, %c0_i32_0 : i32, i32
  }
  func.func @transform_7(%arg0: i32, %arg1: i32) -> (i32, i32) {
    %c0_i32 = arith.constant 0 : i32
    %c0_i32_0 = arith.constant 0 : i32
    %c0_i32_1 = arith.constant 0 : i32
    return %c0_i32, %c0_i32_0 : i32, i32
  }
  func.func @transform_8(%arg0: i32, %arg1: i32) -> (i32, i32) {
    %c0_i32 = arith.constant 0 : i32
    %c0_i32_0 = arith.constant 0 : i32
    %c0_i32_1 = arith.constant 0 : i32
    return %c0_i32, %c0_i32_0 : i32, i32
  }
  func.func @transform_9(%arg0: i32, %arg1: i32) -> (i32, i32) {
    %c0_i32 = arith.constant 0 : i32
    %c0_i32_0 = arith.constant 0 : i32
    %c0_i32_1 = arith.constant 0 : i32
    return %c0_i32, %c0_i32_0 : i32, i32
  }
  func.func @transform_10(%arg0: i32, %arg1: i32) -> (i32, i32, i32) {
    %c0_i32 = arith.constant 0 : i32
    %c0_i32_0 = arith.constant 0 : i32
    return %arg0, %c0_i32, %arg1 : i32, i32, i32
  }
  func.func @transform_11(%arg0: i32, %arg1: i32) -> (i32, i32, i32) {
    %c0_i32 = arith.constant 0 : i32
    %c0_i32_0 = arith.constant 0 : i32
    return %arg0, %c0_i32, %arg1 : i32, i32, i32
  }
  func.func @transform_12(%arg0: i32, %arg1: i32) -> (i32, i32, i32) {
    %c0_i32 = arith.constant 0 : i32
    %c0_i32_0 = arith.constant 0 : i32
    %c0_i32_1 = arith.constant 0 : i32
    return %arg0, %c0_i32, %c0_i32_0 : i32, i32, i32
  }
}

</mosaic_0001>

<bundles_post_ra>
// kernel: tpu_custom_call.1
= control target key start
LH: loop header
LB: loop body
LE: loop exit
PB: predicated region body
PF: predicated region fallthrough
CT: control target
= control target key end

     0   :  { %s3279_s0 = inlined_call_operand.vmem [shape: f32[2,128,32], index: 0, kind: input, shape index: {}]   ;;  %s3280_s1 = inlined_call_operand.vmem [shape: f32[2,1,128], index: 1, kind: input, shape index: {}]   ;;  %s3281_s2 = inlined_call_operand.vmem [shape: f32[32,16], index: 2, kind: input, shape index: {}]   ;;  %s3282_s3 = inlined_call_operand.vmem [shape: f32[1,16], index: 3, kind: input, shape index: {}]   ;;  %s3283_s4 = inlined_call_operand.vmem [shape: f32[8,16], index: 4, kind: input, shape index: {}]   ;;  %s3284_s5 = inlined_call_operand.vmem [shape: f32[8,1], index: 5, kind: input, shape index: {}]   ;;  %s3285_s6 = inlined_call_operand.vmem [shape: f32[32,8], index: 6, kind: input, shape index: {}]   ;;  %s3286_s7 = inlined_call_operand.vmem [shape: f32[1,8], index: 7, kind: input, shape index: {}]   ;;  %s3287_s8 = inlined_call_operand.vmem [shape: f32[8,1], index: 8, kind: input, shape index: {}]   ;;  %s3288_s9 = inlined_call_operand.<no memory space> [shape: f32[1,1], index: 9, kind: input, shape index: {}]   ;;  %s3289_s10 = inlined_call_operand.hbm [shape: f32[2,1,128], index: 10, kind: output, shape index: {0}]   ;;  %s3290_s11 = inlined_call_operand.hbm [shape: s32[2,1,128], index: 11, kind: output, shape index: {1}]   ;;  %s3291_s12 = inlined_call_operand.vmem [shape: f32[2,1,1], index: 12, kind: output, shape index: {2}]  }
   0x1   :  { %3334 = sst [smem:[#allocation66_spill]] %s3279_s0  ;;  %v18_v0 = vstv %s3288_s9 }
   0x2   :  { %3335 = sst [smem:[#allocation67_spill]] %s3280_s1  ;;  %19 = vst [vmem:[#allocation4] sm:$0x1] %v18_v0 }
   0x3   :  { %3336 = sst [smem:[#allocation68_spill]] %s3281_s2 }
   0x4   :  { %3337 = sst [smem:[#allocation69_spill]] %s3282_s3 }
   0x5   :  { %20 = vsyncpa [#allocation6], 0 }
   0x6   :  { %22 = vsyncpa [#allocation6 + $0x1], 0 }
   0x7   :  { %23 = vsyncpa [#allocation8], 0 }
   0x8   :  { %25 = vsyncpa [#allocation8 + $0x1], 0  ;;  %s2071_s23 = smov 0   ;;  %s2073_s24 = smov 0  }
   0x9   :  { %s2075_s25 = smov 0   ;;  %s2077_s26 = smov 0  }
   0xa   :  { %s2079_s27 = smov 0   ;;  %s2081_s28 = smov 0  }
   0xb LB: > { %s1695_s9 = sadd.s32 4294967295, %s1999_s28   ;;  %s1696_s29 = sadd.s32 4294967294, %s1999_s28   ;;  %s1999_s28 = sphi %s2081_s28, %s31_s28   ;;  %s1995_s27 = sphi %s2079_s27, %s3548_s27   ;;  %s1991_s26 = sphi %s2077_s26, %s3547_s26   ;;  %s1987_s25 = sphi %s2075_s25, %s3546_s25   ;;  %s1983_s24 = sphi %s2073_s24, %s3545_s24   ;;  %s1979_s23 = sphi %s2071_s23, %s3544_s23  }
   0xc   : > { %s43_s30 = sadd.s32 1, %s1995_s27  ;;  %s276_s13 = sadd.s32 1, %s1987_s25 }
   0xd   : > { %p45_p0 = scmp.ge.s32.totalorder %s43_s30, 2  ;;  %p286_p1 = scmp.ne.s32.totalorder %s1987_s25, %s1983_s24 }
   0xe   : > { %p287_p2 = scmp.eq.s32.totalorder %s1695_s9, 1  ;;  %p292_p3 = scmp.ne.s32.totalorder %s1983_s24, %s1979_s23 }
   0xf   : > { %s3550_s30 = smov (%p45_p0, %s43_s30), 0  ;;  %p293_p5 = scmp.eq.s32.totalorder %s1696_s29, 1 }
  0x10   : > { %3338 = sst [smem:[#allocation11_spill]] %s3550_s30  ;;  %p2111_p4 = por %p287_p2, %p286_p1 }
  0x11   : > { %s271_s15 = ssub.s32 %s1995_s27, %s3550_s30  ;;  %p1699_p6 = scmp.ge.s32.totalorder %s1999_s28, 1 }
  0x12   : > { %p274_p7 = scmp.eq.s32.totalorder %s271_s15, 0  ;;  %p2118_p8 = por %p293_p5, %p292_p3 }
  0x13   : > { %p411_p9 = scmp.lt.s32.totalorder %s1999_s28, 3 }
  0x14   : > { %s2124_s17 = scalar_select %p274_p7, %s1987_s25, %s276_s13  }
  0x15   : > { %p412_p10 = pnand %p1699_p6, %p411_p9 }
  0x17   : > { %415 = sbr.rel (%p412_p10) target bundleno = 582 (0x246), region = 60 }
  0x1c   : > { %s3341_s2 = sld [smem:[#allocation68_spill]]  ;;  %p470_p11 = scmp.lt.s32.totalorder %s1991_s26, 1  ;;  %vm1437_vm0 = vcmask 1040384   ;;  %vm3325_vm1 = vcmask 261120   ;;  %vm3324_vm2 = vcmask 0   ;;  %v3293_v19 = vmov 0.0  }
  0x1d   : > { %s3342_s1 = sld [smem:[#allocation67_spill]]  ;;  %1411 = vst.msk [vmem:[#allocation3] sm:$0x1] %vm3324_vm2, %v3293_v19  ;;  %v2002_v24 = vmov 0   ;;  %s3217_s15 = sand.u32 1, %s1983_s24  }
  0x1e   : > { %s2137_s29 = scalar_select %p470_p11, %s1991_s26, 1  ;;  %1815 = vset.pattern.permute.xlu0 %v2002_v24  ;;  %1816 = vset.pattern.permute.xlu1 %v2002_v24 }
  0x1f   : > { %s3343_s0 = sld [smem:[#allocation66_spill]]  ;;  %s463_s22 = scalar_lea.vmem [#allocation7], %s3217_s15 }
  0x20   : > { %s1739_s21 = sshll.u32 %s2137_s29, 7  ;;  %s3344_s3 = sld [smem:[#allocation69_spill]] }
  0x21   : > { %s1560_s9 = sshll.u32 %s463_s22, 4  ;;  %s1532_s13 = scalar_lea.sflag [#allocation8], %s3217_s15  ;;  %s1561_s9 = int_to_ptr.vmem [resolvable:$true] %s1560_s9 }
  0x22   : > { %v508_v1 = vld [vmem:[%s3341_s2 + $0x18] sm:$0xff]  ;;  %v507_v2 = vld [vmem:[%s3341_s2 + $0x10] sm:$0xff]  ;;  %v506_v3 = vld [vmem:[%s3341_s2 + $0x8] sm:$0xff] }
  0x23   : > { %1740 = vmatpush.msra.mxu2 %v508_v1  ;;  %1741 = vmatpush.msra.mxu3 %v508_v1  ;;  %v505_v4 = vld [vmem:[%s3341_s2] sm:$0xff]  ;;  %s2146_s20 = scalar_lea.vmem %s3342_s1, %s2137_s29  ;;  %s1909_s2 = scalar_lea.hbm %s3290_s11, 2 }
  0x24   : > { %574 = vmatpush.msra.mxu0 %v508_v1  ;;  %v504_v5 = vld [vmem:[%s2146_s20] sm:$0x1]  ;;  %v1436_v25 = vld [vmem:[#allocation3] sm:$0x1] }
  0x25   : > { %1742 = vmatpush.msra.mxu2 %v507_v2  ;;  %1743 = vmatpush.msra.mxu3 %v507_v2  ;;  %s2153_s30 = scalar_lea.vmem %s3343_s0, %s1739_s21  ;;  %v1438_v6 = vsel %vm1437_vm0, %v504_v5, 0.0  ;;  %s1558_s21 = scalar_lea.hbm %s3290_s11, %s1991_s26 }
  0x26   : > { %575 = vmatpush.msra.mxu0 %v507_v2  ;;  %v495_v7 = vld [vmem:[%s2153_s30 + $0x38] sm:$0xff]  ;;  %1439 = vadd.xlane.f32.xlu0 %v1438_v6  ;;  %v502_v8 = vld [vmem:[%s2153_s30 + $0x70] sm:$0xff]  ;;  %v488_v9 = vld [vmem:[%s2153_s30] sm:$0xff] }
  0x27   : > { %1744 = vmatpush.msra.mxu2 %v506_v3  ;;  %1745 = vmatpush.msra.mxu3 %v506_v3  ;;  %v503_v10 = vld [vmem:[%s2153_s30 + $0x78] sm:$0xff]  ;;  %v496_v11 = vld [vmem:[%s2153_s30 + $0x40] sm:$0xff]  ;;  %v489_v12 = vld [vmem:[%s2153_s30 + $0x8] sm:$0xff] }
  0x28   : > { %576 = vmatpush.msra.mxu0 %v506_v3  ;;  %v501_v13 = vld [vmem:[%s2153_s30 + $0x68] sm:$0xff]  ;;  %v500_v14 = vld [vmem:[%s2153_s30 + $0x60] sm:$0xff]  ;;  %v499_v15 = vld [vmem:[%s2153_s30 + $0x58] sm:$0xff] }
  0x29   : > { %1746 = vmatpush.msra.mxu2 %v505_v4  ;;  %1747 = vmatpush.msra.mxu3 %v505_v4  ;;  %v497_v16 = vld [vmem:[%s2153_s30 + $0x48] sm:$0xff]  ;;  %v498_v17 = vld [vmem:[%s2153_s30 + $0x50] sm:$0xff]  ;;  %v491_v21 = vld [vmem:[%s2153_s30 + $0x18] sm:$0xff] }
  0x2a   : > { %1709 = vmatmul.msk.f32.vlgmr.msra.gmra.mxu2 %vm3325_vm1, %v495_v7  ;;  %1716 = vmatmul.msk.f32.vlgmr.msra.gmra.mxu3 %vm3325_vm1, %v502_v8  ;;  %v490_v18 = vld [vmem:[%s2153_s30 + $0x10] sm:$0xff]  ;;  %v493_v22 = vld [vmem:[%s2153_s30 + $0x28] sm:$0xff]  ;;  %v492_v23 = vld [vmem:[%s2153_s30 + $0x20] sm:$0xff] }
  0x2b   : > { %577 = vmatpush.msra.mxu0 %v505_v4  ;;  %1413 = vmatpush.msrb.mxu2 %v503_v10  ;;  %v494_v20 = vld [vmem:[%s2153_s30 + $0x30] sm:$0xff]  ;;  %v2193_v30 = vld [vmem:[%s3344_s3] ss:$0 sm:$0xff]  ;;  %s1562_s30 = sshll.u32 %s1558_s21, 4  ;;  %s1563_s30 = int_to_ptr.hbm [resolvable:$true] %s1562_s30 }
  0x2c   : > { %1702 = vmatmul.msk.f32.vlgmr.msra.gmra.mxu0 %vm3325_vm1, %v488_v9  ;;  %s1903_s0 = sshra.s32 %s1563_s30, 4  ;;  %s1904_s0 = int_to_ptr.hbm [resolvable:$true] %s1903_s0 }
  0x2d   : > { %1414 = vmatpush.msrb.mxu2 %v502_v8  ;;  %s1905_s18 = scalar_lea.hbm %s1904_s0, 1  ;;  %p1910_p1 = scmp.lt.s32.totalorder %s1904_s0, %s3290_s11 }
  0x2e   : > { %p1906_p12 = scmp.ne.s32.totalorder %s1904_s0, %s1905_s18  ;;  %p1911_p2 = scmp.lt.s32.totalorder %s1909_s2, %s1905_s18 }
  0x2f   : > { %1415 = vmatpush.msrb.mxu2 %v501_v13 }
  0x30   : > { %p1907_p13 = pnand %p1906_p12, %p2111_p4  ;;  %p1912_p3 = por %p1911_p2, %p1910_p1 }
  0x31   : > { %1416 = vmatpush.msrb.mxu2 %v500_v14 }
  0x32   : > { %1710 = vmatmul.msk.f32.gmra.mxu2 %vm3325_vm1, %v496_v11  ;;  %1717 = vmatmul.msk.f32.gmra.mxu3 %vm3325_vm1, %v503_v10  ;;  %p1908_p0 = pneg %p1907_p13 }
  0x33   : > { %1417 = vmatpush.msrb.mxu2 %v499_v15 }
  0x34   : > { %1703 = vmatmul.msk.f32.gmra.mxu0 %vm3325_vm1, %v489_v12  ;;  %p1913_p5 = pnand %p1912_p3, %p1908_p0 }
  0x35   : > { %1418 = vmatpush.msrb.mxu2 %v498_v17 }
  0x37   : > { %1419 = vmatpush.msrb.mxu2 %v497_v16 }
  0x39   : > { %1420 = vmatpush.msrb.mxu2 %v496_v11 }
  0x3a   : > { %1711 = vmatmul.msk.f32.gmra.mxu2 %vm3325_vm1, %v497_v16 }
  0x3b   : > { %1421 = vmatpush.msrb.mxu2 %v495_v7 }
  0x3c   : > { %1704 = vmatmul.msk.f32.gmra.mxu0 %vm3325_vm1, %v490_v18 }
  0x3d   : > { %1422 = vmatpush.msrb.mxu2 %v494_v20 }
  0x3f   : > { %1423 = vmatpush.msrb.mxu2 %v493_v22 }
  0x41   : > { %1424 = vmatpush.msrb.mxu2 %v492_v23 }
  0x42   : > { %1712 = vmatmul.msk.f32.gmra.mxu2 %vm3325_vm1, %v498_v17 }
  0x43   : > { %1425 = vmatpush.msrb.mxu2 %v491_v21 }
  0x44   : > { %1705 = vmatmul.msk.f32.gmra.mxu0 %vm3325_vm1, %v491_v21 }
  0x45   : > { %1426 = vmatpush.msrb.mxu2 %v490_v18 }
  0x47   : > { %1427 = vmatpush.msrb.mxu2 %v489_v12 }
  0x49   : > { %1428 = vmatpush.msrb.mxu2 %v488_v9 }
  0x4a   : > { %1713 = vmatmul.msk.f32.gmra.mxu2 %vm3325_vm1, %v499_v15 }
  0x4c   : > { %1706 = vmatmul.msk.f32.gmra.mxu0 %vm3325_vm1, %v492_v23 }
  0x52   : > { %1714 = vmatmul.msk.f32.gmra.mxu2 %vm3325_vm1, %v500_v14 }
  0x54   : > { %1707 = vmatmul.msk.f32.gmra.mxu0 %vm3325_vm1, %v493_v22 }
  0x5a   : > { %1715 = vmatmul.msk.f32.gmra.mxu2 %vm3325_vm1, %v501_v13 }
  0x5c   : > { %1708 = vmatmul.msk.f32.gmra.mxu0 %vm3325_vm1, %v494_v20 }
  0x62   : > { %1429 = vmatmul.f32.vlgmr.msrb.gmra.mxu2 %v504_v5 }
  0x99   : > { %v1440_v26 = vpop.xlane.xlu0 %1439 }
  0x9a   : > { %v1441_v27 = vadd.f32 %v1440_v26, %v1436_v25 }
  0x9c   : > { %1443 = vst.msk [vmem:[#allocation3] sm:$0x1] %vm3324_vm2, %v1441_v27 }
  0xa3   : > { %v1447_v28 = vld [vmem:[#allocation3] sm:$0x1] }
  0xa4   : > { %v1448_v29 = vmax.f32 %v1447_v28, 1.0 }
  0xa6   : > { %1452 = vperm.xlu0 %1815, %v1448_v29  }
  0xa9   : > { %v579_v41 = vpop.f32.mrf.mxu0 }
  0xaa   : > { %v2209_v42 = vadd.f32 %v2193_v30, %v579_v41 }
  0xac   : > { %3347 = vst [vmem:[#allocation14_spill] sm:$0xff] %v2209_v42  ;;  %v2217_v48 = vmul.f32 0.70710677, %v2209_v42 }
  0xad   : > { %v600_v31 = vpop.f32.mrf.mxu2  ;;  %v621_v34 = vpop.f32.mrf.mxu3 }
  0xae   : > { %v601_v32 = vadd.f32 %v2193_v30, %v600_v31  ;;  %v2199_v35 = vadd.f32 %v2193_v30, %v621_v34  ;;  %3348 = vst [vmem:[#allocation15_spill] sm:$0xff] %v2217_v48  ;;  %v2225_v53 = vand.u32 2147483647, %v2217_v48 }
  0xb0   : > { %v2196_v33 = vmul.f32 0.70710677, %v601_v32  ;;  %v2204_v39 = vmul.f32 0.70710677, %v2199_v35  ;;  %v675_v61 = vmul.f32 0.3275911, %v2225_v53 }
  0xb1   : > { %v582_v59 = vpop.f32.mrf.mxu0  ;;  %v2269_v17 = vmul.f32 0.5, %v601_v32 }
  0xb2   : > { %3345 = vst [vmem:[#allocation12_spill] sm:$0xff] %v2196_v33  ;;  %v666_v38 = vand.u32 2147483647, %v2196_v33  ;;  %v2212_v44 = vand.u32 2147483647, %v2204_v39  ;;  %v2247_v3 = vadd.f32 1.0, %v675_v61  ;;  %v2265_v15 = vadd.f32 %v2193_v30, %v582_v59 }
  0xb3   : > { %3353 = vst [vmem:[#allocation20_spill] sm:$0xff] %v2269_v17 }
  0xb4   : > { %v682_v43 = vmul.f32 0.3275911, %v666_v38  ;;  %v689_v50 = vmul.f32 0.3275911, %v2212_v44  ;;  %v1098_v62 = vmul.f32 %v666_v38, %v666_v38  ;;  %3351 = vst [vmem:[#allocation18_spill] sm:$0xff] %v2247_v3 }
  0xb5   : > { %v603_v36 = vpop.f32.mrf.mxu2  ;;  %v624_v55 = vpop.f32.mrf.mxu3  ;;  %3352 = vst [vmem:[#allocation19_spill] sm:$0xff] %v2265_v15  ;;  %v2283_v32 = vmul.f32 0.70710677, %v2265_v15 }
  0xb6   : > { %v604_v37 = vadd.f32 %v2193_v30, %v603_v36  ;;  %v2219_v49 = vadd.f32 1.0, %v682_v43  ;;  %v2228_v54 = vadd.f32 1.0, %v689_v50  ;;  %v2238_v63 = vadd.f32 %v2193_v30, %v624_v55 }
  0xb7   : > { %v1114_v4 = vsub.f32 0.0, %v1098_v62  ;;  %3356 = vst [vmem:[#allocation23_spill] sm:$0xff] %v2283_v32  ;;  %v1105_v50 = vmul.f32 %v2212_v44, %v2212_v44 }
  0xb8   : > { %v2206_v40 = vmul.f32 0.70710677, %v604_v37  ;;  %1819 = vrcp.f32 %v2219_v49  ;;  %v2250_v5 = vmul.f32 0.70710677, %v2238_v63  ;;  %v823_v11 = vand.u32 2147483648, %v2219_v49 }
  0xb9   : > { %1821 = vrcp.f32 %v2228_v54  ;;  %v1137_v13 = vmul.f32 1.442695, %v1114_v4  ;;  %v2267_v16 = vpop.f32.mrf.mxu0  ;;  %v2277_v27 = vmul.f32 0.5, %v604_v37  ;;  %v928_v62 = vand.u32 2147483648, %v2228_v54 }
  0xba   : > { %3346 = vst [vmem:[#allocation13_spill] sm:$0xff] %v2206_v40  ;;  %v667_v45 = vand.u32 2147483647, %v2206_v40  ;;  %v674_v14 = vand.u32 2147483647, %v2250_v5  ;;  %v2275_v26 = vor.u32 1.1754944e-38, %v823_v11  ;;  %vm922_vm5 = vweird.f32 %v2228_v54 }
  0xbb   : > { %3355 = vst [vmem:[#allocation22_spill] sm:$0xff] %v2277_v27 }
  0xbc   : > { %v683_v51 = vmul.f32 0.3275911, %v667_v45  ;;  %v1099_v7 = vmul.f32 %v667_v45, %v667_v45  ;;  %3354 = vst [vmem:[#allocation21_spill] sm:$0xff] %v2275_v26  ;;  %v690_v31 = vmul.f32 0.3275911, %v674_v14  ;;  %v1106_v55 = vmul.f32 %v674_v14, %v674_v14 }
  0xbd   : > { %v606_v46 = vpop.f32.mrf.mxu2  ;;  %v718_v14 = vand.u32 2147483648, %v2247_v3 }
  0xbe   : > { %v607_v47 = vadd.f32 %v2193_v30, %v606_v46  ;;  %v2230_v56 = vadd.f32 1.0, %v683_v51  ;;  %v2241_v0 = vpop.eup %1819  ;;  %v1115_v20 = vsub.f32 0.0, %v1099_v7 }
  0xbf   : > { %v813_v6 = vmul.f32 %v2241_v0, %v2219_v49  ;;  %v2257_v10 = vpop.eup %1821 }
  0xc0   : > { %v2222_v52 = vmul.f32 0.70710677, %v607_v47  ;;  %1823 = vrcp.f32 %v2230_v56  ;;  %v918_v24 = vmul.f32 %v2257_v10, %v2228_v54  ;;  %v838_v29 = vand.u32 2147483648, %v2230_v56 }
  0xc1   : > { %1825 = vrcp.f32 %v2247_v3  ;;  %v814_v18 = vsub.f32 1.0, %v813_v6  ;;  %v1139_v38 = vmul.f32 1.442695, %v1115_v20  ;;  %v2288_v41 = vmul.f32 0.5, %v607_v47 }
  0xc2   : > { %3349 = vst [vmem:[#allocation16_spill] sm:$0xff] %v2222_v52  ;;  %v668_v57 = vand.u32 2147483647, %v2222_v52  ;;  %v919_v46 = vsub.f32 1.0, %v918_v24  ;;  %v2306_v59 = vor.u32 1.1754944e-38, %v838_v29  ;;  %vm923_vm6 = vweird.f32 %v2257_v10 }
  0xc3   : > { %v815_v36 = vmul.f32 %v2241_v0, %v814_v18  ;;  %3358 = vst [vmem:[#allocation25_spill] sm:$0xff] %v2288_v41  ;;  %v2321_v18 = vpop.f32.mrf.mxu0 }
  0xc4   : > { %v684_v1 = vmul.f32 0.3275911, %v668_v57  ;;  %v1100_v22 = vmul.f32 %v668_v57, %v668_v57  ;;  %v2299_v57 = vmul.f32 0.5, %v2199_v35  ;;  %v920_v11 = vmul.f32 %v2257_v10, %v919_v46 }
  0xc5   : > { %v609_v58 = vpop.f32.mrf.mxu2 }
  0xc6   : > { %v2234_v60 = vadd.f32 %v2193_v30, %v609_v58  ;;  %v2254_v8 = vadd.f32 1.0, %v684_v1  ;;  %v2261_v12 = vpop.eup %1823  ;;  %v1116_v43 = vsub.f32 0.0, %v1100_v22  ;;  %3359 = vst [vmem:[#allocation26_spill] sm:$0xff] %v2299_v57  ;;  %v2313_v1 = vadd.f32 %v2241_v0, %v815_v36 }
  0xc7   : > { %v828_v28 = vmul.f32 %v2261_v12, %v2230_v56  ;;  %v2285_v34 = vpop.eup %1825  ;;  %v2327_v36 = vadd.f32 1.0, %v690_v31 }
  0xc8   : > { %v2245_v2 = vmul.f32 0.70710677, %v2234_v60  ;;  %1827 = vrcp.f32 %v2254_v8  ;;  %3357 = vst [vmem:[#allocation24_spill] sm:$0xff] %v2285_v34  ;;  %v708_v44 = vmul.f32 %v2285_v34, %v2247_v3  ;;  %v853_v35 = vand.u32 2147483648, %v2254_v8 }
  0xc9   : > { %1829 = vpow2.f32 %v1137_v13  ;;  %v829_v51 = vsub.f32 1.0, %v828_v28  ;;  %3360 = vst [vmem:[#allocation27_spill] sm:$0xff] %v2313_v1  ;;  %v1141_v7 = vmul.f32 1.442695, %v1116_v43  ;;  %v1121_v13 = vsub.f32 0.0, %v1105_v50 }
  0xca   : > { %3350 = vst [vmem:[#allocation17_spill] sm:$0xff] %v2245_v2  ;;  %v669_v9 = vand.u32 2147483647, %v2245_v2  ;;  %1831 = vpow2.f32 %v1139_v38  ;;  %v709_v29 = vsub.f32 1.0, %v708_v44  ;;  %v2334_v46 = vmul.f32 0.5, %v2234_v60 }
  0xcb   : > { %v830_v20 = vmul.f32 %v2261_v12, %v829_v51  ;;  %v2336_v50 = vor.u32 1.1754944e-38, %v928_v62  ;;  %v2338_v25 = vor.u32 1.1754944e-38, %v853_v35  ;;  %v1151_v60 = vmul.f32 1.442695, %v1121_v13  ;;  %v2377_v48 = vpop.f32.mrf.mxu0 }
  0xcc   : > { %v685_v23 = vmul.f32 0.3275911, %v669_v9  ;;  %v1101_v28 = vmul.f32 %v669_v9, %v669_v9  ;;  %3362 = vst [vmem:[#allocation29_spill] sm:$0xff] %v2334_v46  ;;  %v943_v41 = vand.u32 2147483648, %v2327_v36  ;;  %vm937_vm3 = vweird.f32 %v2327_v36 }
  0xcd   : > { %v612_v21 = vpop.f32.mrf.mxu2  ;;  %v2353_v62 = vadd.f32 %v2261_v12, %v830_v20  ;;  %v1122_v20 = vsub.f32 0.0, %v1106_v55 }
  0xce   : > { %v2291_v37 = vadd.f32 %v2193_v30, %v612_v21  ;;  %v2293_v45 = vadd.f32 1.0, %v685_v23  ;;  %v2304_v47 = vpop.eup %1827  ;;  %v660_v23 = vand.u32 2147483647, %v2283_v32  ;;  %v1117_v35 = vsub.f32 0.0, %v1101_v28 }
  0xcf   : > { %v2317_v6 = vpop.eup %1829  ;;  %v843_v21 = vmul.f32 %v2304_v47, %v2254_v8 }
  0xd0   : > { %v2302_v58 = vmul.f32 0.70710677, %v2291_v37  ;;  %3361 = vst [vmem:[#allocation28_spill] sm:$0xff] %v2317_v6  ;;  %1833 = vrcp.f32 %v2293_v45  ;;  %v676_v51 = vmul.f32 0.3275911, %v660_v23  ;;  %v2345_v31 = vpop.eup %1831  ;;  %v868_v13 = vand.u32 2147483648, %v2293_v45 }
  0xd1   : > { %3363 = vst [vmem:[#allocation30_spill] sm:$0xff] %v2345_v31  ;;  %v844_v44 = vsub.f32 1.0, %v843_v21  ;;  %1835 = vpow2.f32 %v1141_v7  ;;  %v1091_v21 = vmul.f32 %v2225_v53, %v2225_v53  ;;  %v1143_v42 = vmul.f32 1.442695, %v1117_v35 }
  0xd2   : > { %v670_v4 = vand.u32 2147483647, %v2302_v58  ;;  %1837 = vrcp.f32 %v2327_v36  ;;  %v2360_v7 = vadd.f32 1.0, %v676_v51  ;;  %v2387_v51 = vor.u32 1.1754944e-38, %v868_v13 }
  0xd3   : > { %v1107_v32 = vsub.f32 0.0, %v1091_v21  ;;  %v2389_v35 = vor.u32 1.1754944e-38, %v718_v14  ;;  %v2424_v31 = vor.u32 1.1754944e-38, %v943_v41  ;;  %v594_v3 = vpop.f32.mrf.mxu0  ;;  %vm862_vm9 = vweird.f32 %v2293_v45 }
  0xd4   : > { %v686_v22 = vmul.f32 0.3275911, %v670_v4  ;;  %3364 = vst [vmem:[#allocation31_spill] sm:$0xff] %v2360_v7  ;;  %v1102_v17 = vmul.f32 %v670_v4, %v670_v4  ;;  %v2395_v4 = vmul.f32 0.5, %v2238_v63 }
  0xd5   : > { %v615_v24 = vpop.f32.mrf.mxu2  ;;  %3369 = vst [vmem:[#allocation36_spill] sm:$0xff] %v2389_v35 }
  0xd6   : > { %v2330_v38 = vadd.f32 %v2193_v30, %v615_v24  ;;  %v2340_v19 = vadd.f32 1.0, %v686_v22  ;;  %v2348_v24 = vadd.f32 %v2257_v10, %v920_v11  ;;  %v2350_v43 = vpop.eup %1833  ;;  %v710_v22 = vmul.f32 %v2285_v34, %v709_v29  ;;  %3370 = vst [vmem:[#allocation37_spill] sm:$0xff] %v2395_v4 }
  0xd7   : > { %v2364_v11 = vadd.f32 %v2193_v30, %v2267_v16  ;;  %v845_v29 = vmul.f32 %v2304_v47, %v844_v44  ;;  %v858_v61 = vmul.f32 %v2350_v43, %v2293_v45  ;;  %v2379_v55 = vpop.eup %1835  ;;  %vm863_vm10 = vweird.f32 %v2350_v43 }
  0xd8   : > { %v2343_v9 = vmul.f32 0.70710677, %v2330_v38  ;;  %1839 = vrcp.f32 %v2340_v19  ;;  %v2375_v16 = vadd.f32 %v2285_v34, %v710_v22  ;;  %3367 = vst [vmem:[#allocation34_spill] sm:$0xff] %v2379_v55  ;;  %v2385_v53 = vpop.eup %1837  ;;  %v1153_v22 = vmul.f32 1.442695, %v1122_v20 }
  0xd9   : > { %3365 = vst [vmem:[#allocation32_spill] sm:$0xff] %v2364_v11  ;;  %1841 = vpow2.f32 %v1151_v60  ;;  %v2383_v44 = vmul.f32 0.70710677, %v2364_v11  ;;  %v2392_v27 = vadd.f32 %v2304_v47, %v845_v29  ;;  %v859_v6 = vsub.f32 1.0, %v858_v61 }
  0xda   : > { %v671_v28 = vand.u32 2147483647, %v2343_v9  ;;  %3366 = vst [vmem:[#allocation33_spill] sm:$0xff] %v2375_v16  ;;  %1843 = vrcp.f32 %v2360_v7  ;;  %v1092_v16 = vmul.f32 %v660_v23, %v660_v23  ;;  %v2408_v20 = vmul.f32 1.442695, %v1107_v32 }
  0xdb   : > { %3368 = vst [vmem:[#allocation35_spill] sm:$0xff] %v2383_v44  ;;  %v661_v21 = vand.u32 2147483647, %v2383_v44  ;;  %1845 = vpow2.f32 %v1143_v42  ;;  %v1118_v61 = vsub.f32 0.0, %v1102_v17  ;;  %v933_v63 = vmul.f32 %v2385_v53, %v2327_v36 }
  0xdc   : > { %v687_v15 = vmul.f32 0.3275911, %v671_v28  ;;  %3371 = vst [vmem:[#allocation38_spill] sm:$0xff] %v2408_v20  ;;  %v2413_v44 = vmul.f32 0.5, %v2291_v37  ;;  %1847 = vpow2.f32 %v1153_v22  ;;  %v1103_v20 = vmul.f32 %v671_v28, %v671_v28 }
  0xdd   : > { %v618_v60 = vpop.f32.mrf.mxu2  ;;  %v677_v29 = vmul.f32 0.3275911, %v661_v21  ;;  %v883_v33 = vand.u32 2147483648, %v2340_v19  ;;  %v934_v22 = vsub.f32 1.0, %v933_v63  ;;  %v2431_v42 = vmul.f32 0.5, %v2330_v38 }
  0xde   : > { %v2398_v11 = vpop.eup %1839  ;;  %v2401_v13 = vadd.f32 1.0, %v687_v15  ;;  %v2404_v14 = vadd.f32 %v2193_v30, %v618_v60  ;;  %3372 = vst [vmem:[#allocation39_spill] sm:$0xff] %v2413_v44  ;;  %v1108_v15 = vsub.f32 0.0, %v1092_v16  ;;  %v860_v60 = vmul.f32 %v2350_v43, %v859_v6 }
  0xdf   : > { %v2406_v23 = vpop.eup %1841  ;;  %v873_v32 = vmul.f32 %v2398_v11, %v2340_v19  ;;  %v2421_v17 = vadd.f32 1.0, %v677_v29  ;;  %v1145_v16 = vmul.f32 1.442695, %v1118_v61  ;;  %3375 = vst [vmem:[#allocation42_spill] sm:$0xff] %v2431_v42  ;;  %v1119_v63 = vsub.f32 0.0, %v1103_v20 }
  0xe0   : > { %v2416_v35 = vpop.eup %1843  ;;  %1849 = vrcp.f32 %v2401_v13  ;;  %v2428_v37 = vmul.f32 0.70710677, %v2404_v14  ;;  %v1125_v29 = vmul.f32 1.442695, %v1108_v15  ;;  %v2441_v40 = vadd.f32 %v2350_v43, %v860_v60 }
  0xe1   : > { %3373 = vst [vmem:[#allocation40_spill] sm:$0xff] %v2416_v35  ;;  %1851 = vrcp.f32 %v2421_v17  ;;  %v2434_v6 = vpop.eup %1845  ;;  %v723_v41 = vmul.f32 %v2416_v35, %v2360_v7  ;;  %v874_v61 = vsub.f32 1.0, %v873_v32  ;;  %v1093_v38 = vmul.f32 %v661_v21, %v661_v21 }
  0xe2   : > { %3374 = vst [vmem:[#allocation41_spill] sm:$0xff] %v2421_v17  ;;  %v672_v34 = vand.u32 2147483647, %v2428_v37  ;;  %v2443_v55 = vpop.eup %1847  ;;  %v2445_v46 = vor.u32 1.1754944e-38, %v883_v33  ;;  %v733_v44 = vand.u32 2147483648, %v2360_v7  ;;  %v898_v28 = vand.u32 2147483648, %v2401_v13  ;;  %v597_v7 = vpop.f32.mrf.mxu0 }
  0xe3   : > { %3376 = vst [vmem:[#allocation43_spill] sm:$0xff] %v2434_v6  ;;  %1853 = vpow2.f32 %v1145_v16  ;;  %v935_v15 = vmul.f32 %v2385_v53, %v934_v22  ;;  %v2453_v60 = vadd.f32 %v2193_v30, %v2321_v18  ;;  %v724_v21 = vsub.f32 1.0, %v723_v41 }
  0xe4   : > { %v688_v42 = vmul.f32 0.3275911, %v672_v34  ;;  %1855 = vpow2.f32 %v1125_v29  ;;  %v2461_v32 = vadd.f32 %v2193_v30, %v2377_v48  ;;  %v875_v16 = vmul.f32 %v2398_v11, %v874_v61 }
  0xe5   : > { %3377 = vst [vmem:[#allocation44_spill] sm:$0xff] %v2453_v60  ;;  %v1147_v22 = vmul.f32 1.442695, %v1119_v63  ;;  %v1109_v52 = vsub.f32 0.0, %v1093_v38  ;;  %v2467_v1 = vmul.f32 0.70710677, %v2453_v60  ;;  %v1104_v6 = vmul.f32 %v672_v34, %v672_v34 }
  0xe6   : > { %v2455_v20 = vpop.eup %1849  ;;  %v2457_v33 = vadd.f32 1.0, %v688_v42  ;;  %3378 = vst [vmem:[#allocation45_spill] sm:$0xff] %v2461_v32  ;;  %v2469_v18 = vor.u32 1.1754944e-38, %v733_v44  ;;  %v2472_v29 = vor.u32 1.1754944e-38, %v898_v28  ;;  %v748_v42 = vand.u32 2147483648, %v2421_v17 }
  0xe7   : > { %v2463_v26 = vpop.eup %1851  ;;  %3380 = vst [vmem:[#allocation47_spill] sm:$0xff] %v2467_v1  ;;  %v888_v48 = vmul.f32 %v2455_v20, %v2401_v13  ;;  %v2479_v61 = vadd.f32 %v2193_v30, %v594_v3  ;;  %v725_v63 = vmul.f32 %v2416_v35, %v724_v21  ;;  %v662_v38 = vand.u32 2147483647, %v2467_v1 }
  0xe8   : > { %3379 = vst [vmem:[#allocation46_spill] sm:$0xff] %v2463_v26  ;;  %1857 = vrcp.f32 %v2457_v33  ;;  %v738_v44 = vmul.f32 %v2463_v26, %v2421_v17  ;;  %v2486_v28 = vmul.f32 0.70710677, %v2461_v32  ;;  %v2491_v60 = vadd.f32 %v2398_v11, %v875_v16 }
  0xe9   : > { %3381 = vst [vmem:[#allocation48_spill] sm:$0xff] %v2469_v18  ;;  %v2488_v41 = vpop.eup %1853  ;;  %vm938_vm4 = vweird.f32 %v2385_v53  ;;  %1859 = vpow2.f32 %v1147_v22  ;;  %v1127_v3 = vmul.f32 1.442695, %v1109_v52  ;;  %v2496_v34 = vmul.f32 0.5, %v2404_v14 }
  0xea   : > { %3382 = vst [vmem:[#allocation49_spill] sm:$0xff] %v2479_v61  ;;  %v2498_v21 = vpop.eup %1855  ;;  %v678_v32 = vmul.f32 0.3275911, %v662_v38  ;;  %v1094_v18 = vmul.f32 %v662_v38, %v662_v38  ;;  %v663_v57 = vand.u32 2147483647, %v2486_v28  ;;  %v889_v16 = vsub.f32 1.0, %v888_v48  ;;  %vm2564_vm15 = vmor %vm937_vm3, %vm938_vm4 }
  0xeb   : > { %3383 = vst [vmem:[#allocation50_spill] sm:$0xff] %v2486_v28  ;;  %v1120_v4 = vsub.f32 0.0, %v1104_v6  ;;  %v2505_v2 = vmul.f32 0.70710677, %v2479_v61  ;;  %v2512_v14 = vadd.f32 %v2416_v35, %v725_v63  ;;  %v739_v22 = vsub.f32 1.0, %v738_v44  ;;  %vm2589_vm3 = vmor %vm922_vm5, %vm923_vm6 }
  0xec   : > { %3384 = vst [vmem:[#allocation51_spill] sm:$0xff] %v2488_v41  ;;  %v2502_v41 = vor.u32 1.1754944e-38, %v748_v42  ;;  %v2514_v38 = vadd.f32 1.0, %v678_v32  ;;  %v679_v1 = vmul.f32 0.3275911, %v663_v57  ;;  %1861 = vpow2.f32 %v1127_v3 }
  0xed   : > { %3385 = vst [vmem:[#allocation52_spill] sm:$0xff] %v2496_v34  ;;  %v664_v48 = vand.u32 2147483647, %v2505_v2  ;;  %v598_v42 = vadd.f32 %v2193_v30, %v597_v7  ;;  %v1095_v61 = vmul.f32 %v663_v57, %v663_v57  ;;  %v936_v28 = vadd.f32 %v2385_v53, %v935_v15 }
  0xee   : > { %3386 = vst [vmem:[#allocation53_spill] sm:$0xff] %v2498_v21  ;;  %v2507_v52 = vpop.eup %1857  ;;  %1863 = vrcp.f32 %v2514_v38  ;;  %v1110_v21 = vsub.f32 0.0, %v1094_v18  ;;  %v890_v32 = vmul.f32 %v2455_v20, %v889_v16  ;;  %v913_v44 = vand.u32 2147483648, %v2457_v33 }
  0xef   : > { %3387 = vst [vmem:[#allocation54_spill] sm:$0xff] %v2502_v41  ;;  %v903_v6 = vmul.f32 %v2507_v52, %v2457_v33  ;;  %v2522_v63 = vpop.eup %1859  ;;  %v1149_v3 = vmul.f32 1.442695, %v1120_v4  ;;  %v2526_v41 = vadd.f32 1.0, %v679_v1  ;;  %v740_v30 = vmul.f32 %v2463_v26, %v739_v22 }
  0xf0   : > { %3388 = vst [vmem:[#allocation55_spill] sm:$0xff] %v2505_v2  ;;  %vm907_vm8 = vweird.f32 %v2457_v33  ;;  %v680_v7 = vmul.f32 0.3275911, %v664_v48  ;;  %v911_v4 = vand.u32 2147483647, %v2457_v33  ;;  %v763_v1 = vand.u32 2147483648, %v2514_v38 }
  0xf1   : > { %3389 = vst [vmem:[#allocation56_spill] sm:$0xff] %v2512_v14  ;;  %v3391_v14 = vand.u32 2147483647, %v2228_v54  ;;  %v904_v57 = vsub.f32 1.0, %v903_v6  ;;  %v1096_v15 = vmul.f32 %v664_v48, %v664_v48  ;;  %v2540_v18 = vmul.f32 0.70710677, %v598_v42 }
  0xf2   : > { %3390 = vst [vmem:[#allocation57_spill] sm:$0xff] %v2514_v38  ;;  %vm877_vm11 = vweird.f32 %v2340_v19  ;;  %vm878_vm12 = vweird.f32 %v2398_v11  ;;  %v1129_v16 = vmul.f32 1.442695, %v1110_v21  ;;  %1865 = vrcp.f32 %v2526_v41  ;;  %v2547_v6 = vpop.eup %1861 }
  0xf3   : > { %vm2530_vm7 = vcmp.eq.f32.partialorder %v3391_v14, 8.507059e+37  ;;  %3394 = vst [vmem:[#allocation58_spill] sm:$0xff] %v2540_v18  ;;  %v1111_v14 = vsub.f32 0.0, %v1095_v61  ;;  %v2545_v22 = vadd.f32 1.0, %v680_v7  ;;  %v2550_v34 = vadd.f32 %v2455_v20, %v890_v32 }
  0xf4   : > { %3395 = vst [vmem:[#allocation59_spill] sm:$0xff] %v2547_v6  ;;  %vm892_vm13 = vweird.f32 %v2401_v13  ;;  %vm893_vm14 = vweird.f32 %v2455_v20  ;;  %v2554_v48 = vor.u32 1.1754944e-38, %v913_v44  ;;  %1867 = vpow2.f32 %v1149_v3  ;;  %v2558_v21 = vpop.eup %1863 }
  0xf5   : > { %v2556_v17 = vmul.f32 0.5, %v598_v42  ;;  %v2569_v32 = vadd.f32 %v2463_v26, %v740_v30  ;;  %v905_v7 = vmul.f32 %v2507_v52, %v904_v57  ;;  %vm908_vm0 = vweird.f32 %v2507_v52 }
  0xf6   : > { %vm2574_vm2 = vcmp.eq.f32.partialorder %v911_v4, 8.507059e+37  ;;  %v753_v3 = vmul.f32 %v2558_v21, %v2514_v38  ;;  %v2580_v6 = vor.u32 1.1754944e-38, %v763_v1  ;;  %1869 = vrcp.f32 %v2545_v22 }
  0xf7   : > { %3396 = vst [vmem:[#allocation60_spill] sm:$0xff] %v2556_v17  ;;  %v1112_v17 = vsub.f32 0.0, %v1096_v15  ;;  %1871 = vpow2.f32 %v1129_v16  ;;  %v1131_v57 = vmul.f32 1.442695, %v1111_v14  ;;  %v3405_v1 = vand.u32 2147483647, %v2401_v13 }
  0xf8   : > { %3399 = vst [vmem:[#allocation61_spill] sm:$0xff] %v2569_v32  ;;  %v665_v32 = vand.u32 2147483647, %v2540_v18  ;;  %v754_v15 = vsub.f32 1.0, %v753_v3  ;;  %v778_v16 = vand.u32 2147483648, %v2526_v41  ;;  %v940_v14 = vsel %vm2564_vm15, %v2385_v53, %v936_v28  ;;  %v2605_v54 = vpop.eup %1865 }
  0xf9   : > { %3402 = vst [vmem:[#allocation62_spill] sm:$0xff] %v2580_v6  ;;  %vm2595_vm4 = vcmp.eq.f32.partialorder %v3405_v1, 8.507059e+37  ;;  %v3408_v30 = vand.u32 2147483647, %v2327_v36  ;;  %vm848_vm6 = vweird.f32 %v2304_v47  ;;  %v906_v1 = vadd.f32 %v2507_v52, %v905_v7 }
  0xfa   : > { %v681_v18 = vmul.f32 0.3275911, %v665_v32  ;;  %v1097_v6 = vmul.f32 %v665_v32, %v665_v32  ;;  %v2613_v38 = vpop.eup %1867  ;;  %v3409_v53 = vand.u32 2147483647, %v2293_v45  ;;  %v3412_v28 = vand.u32 2147483647, %v2340_v19 }
  0xfb   : > { %vm942_vm1 = vcmp.eq.f32.partialorder %v3408_v30, 8.507059e+37  ;;  %v768_v32 = vmul.f32 %v2605_v54, %v2526_v41  ;;  %v1133_v7 = vmul.f32 1.442695, %v1112_v17  ;;  %1873 = vpow2.f32 %v1131_v57 }
  0xfc   : > { %v2611_v3 = vsel %vm942_vm1, %v2424_v31, %v940_v14  ;;  %vm2617_vm15 = vcmp.eq.f32.partialorder %v3409_v53, 8.507059e+37  ;;  %vm2623_vm5 = vcmp.eq.f32.partialorder %v3412_v28, 8.507059e+37  ;;  %v793_v31 = vand.u32 2147483648, %v2545_v22  ;;  %v2637_v26 = vpop.eup %1869  ;;  %vm2643_vm1 = vmor %vm907_vm8, %vm908_vm0 }
  0xfd   : > { %v962_v30 = vmul.f32 1.0614054, %v2611_v3  ;;  %v2631_v14 = vadd.f32 1.0, %v681_v18  ;;  %v1113_v53 = vsub.f32 0.0, %v1097_v6  ;;  %v925_v28 = vsel %vm2589_vm3, %v2257_v10, %v2348_v24  ;;  %v2653_v10 = vpop.eup %1871  ;;  %vm2659_vm3 = vmor %vm862_vm9, %vm863_vm10 }
  0xfe   : > { %v755_v17 = vmul.f32 %v2558_v21, %v754_v15  ;;  %v769_v18 = vsub.f32 1.0, %v768_v32  ;;  %v2651_v6 = vsel %vm2530_vm7, %v2336_v50, %v925_v28  ;;  %3417 = vst [vmem:[#allocation63_spill] sm:$0xff] %v2653_v10  ;;  %v2663_v33 = vor.u32 1.1754944e-38, %v778_v16  ;;  %vm2679_vm8 = vmor %vm877_vm11, %vm878_vm12 }
  0xff   : > { %v978_v57 = vadd.f32 -1.4531521, %v962_v30  ;;  %v783_v4 = vmul.f32 %v2637_v26, %v2545_v22  ;;  %1875 = vrcp.f32 %v2631_v14  ;;  %v3421_v2 = vand.u32 2147483647, %v2254_v8  ;;  %vm2693_vm0 = vmor %vm892_vm13, %vm893_vm14 }
 0x100   : > { %3420 = vst [vmem:[#allocation64_spill] sm:$0xff] %v2663_v33  ;;  %v770_v16 = vmul.f32 %v2605_v54, %v769_v18  ;;  %v2684_v32 = vor.u32 1.1754944e-38, %v793_v31  ;;  %1877 = vpow2.f32 %v1133_v7  ;;  %v808_v30 = vand.u32 2147483648, %v2631_v14 }
 0x101   : > { %vm2671_vm7 = vcmp.eq.f32.partialorder %v3421_v2, 8.507059e+37  ;;  %vm832_vm9 = vweird.f32 %v2230_v56  ;;  %vm833_vm10 = vweird.f32 %v2261_v12  ;;  %v1135_v28 = vmul.f32 1.442695, %v1113_v53  ;;  %v2709_v33 = vpop.eup %1873 }
 0x102   : > { %3426 = vst [vmem:[#allocation65_spill] sm:$0xff] %v2684_v32  ;;  %v994_v18 = vmul.f32 %v978_v57, %v2611_v3  ;;  %v961_v31 = vmul.f32 1.0614054, %v2651_v6  ;;  %v910_v7 = vsel %vm2643_vm1, %v2507_v52, %v906_v1  ;;  %v2703_v2 = vadd.f32 %v2558_v21, %v755_v17  ;;  %vm2798_vm14 = vmor %vm832_vm9, %vm833_vm10 }
 0x103   : > { %v2706_v15 = vadd.f32 %v2605_v54, %v770_v16  ;;  %v784_v13 = vsub.f32 1.0, %v783_v4  ;;  %v806_v10 = vand.u32 2147483647, %v2631_v14  ;;  %v2711_v53 = vor.u32 1.1754944e-38, %v808_v30 }
 0x104   : > { %v1010_v57 = vadd.f32 1.4214138, %v994_v18  ;;  %v977_v32 = vadd.f32 -1.4531521, %v961_v31  ;;  %v2716_v35 = vsel %vm2574_vm2, %v2554_v48, %v910_v7  ;;  %v895_v1 = vsel %vm2693_vm0, %v2455_v20, %v2550_v34 }
 0x105   : > { %v960_v52 = vmul.f32 1.0614054, %v2716_v35  ;;  %v880_v17 = vsel %vm2679_vm8, %v2398_v11, %v2491_v60  ;;  %v865_v4 = vsel %vm2659_vm3, %v2350_v43, %v2441_v40  ;;  %v2731_v44 = vpop.eup %1875  ;;  %1879 = vpow2.f32 %v1135_v28 }
 0x106   : > { %v1026_v48 = vmul.f32 %v1010_v57, %v2611_v3  ;;  %v993_v16 = vmul.f32 %v977_v32, %v2651_v6  ;;  %v2738_v20 = vsel %vm2595_vm4, %v2472_v29, %v895_v1  ;;  %v2740_v34 = vpop.eup %1877  ;;  %vm3429_vm2 = vweird.f32 %v2254_v8  ;;  %v1474_v1 = vld [vmem:[%s3285_s6 + $0x18] sm:$0xff] }
 0x107   : > { %vm2746_vm11 = vmor %vm3429_vm2, %vm848_vm6  ;;  %v785_v43 = vmul.f32 %v2637_v26, %v784_v13  ;;  %v798_v11 = vmul.f32 %v2731_v44, %v2631_v14  ;;  %v976_v60 = vadd.f32 -1.4531521, %v960_v52  ;;  %v959_v42 = vmul.f32 1.0614054, %v2738_v20  ;;  %1491 = vmatpush.msrb.mxu3 %v1474_v1 }
 0x108   : > { %v1042_v29 = vadd.f32 -0.28449672, %v1026_v48  ;;  %v1009_v24 = vadd.f32 1.4214138, %v993_v16  ;;  %v2757_v45 = vsel %vm2623_vm5, %v2445_v46, %v880_v17  ;;  %v2762_v8 = vsel %vm2617_vm15, %v2387_v51, %v865_v4 }
 0x109   : > { %v3432_v32 = vand.u32 2147483647, %v2230_v56  ;;  %v799_v19 = vsub.f32 1.0, %v798_v11  ;;  %v992_v28 = vmul.f32 %v976_v60, %v2716_v35  ;;  %v975_v18 = vadd.f32 -1.4531521, %v959_v42 }
 0x10a   : > { %v958_v31 = vmul.f32 1.0614054, %v2757_v45  ;;  %v1058_v46 = vmul.f32 %v1042_v29, %v2611_v3  ;;  %v1025_v61 = vmul.f32 %v1009_v24, %v2651_v6  ;;  %v957_v36 = vmul.f32 1.0614054, %v2762_v8 }
 0x10b   : > { %vm2766_vm12 = vcmp.eq.f32.partialorder %v3432_v32, 8.507059e+37  ;;  %v850_v51 = vsel %vm2746_vm11, %v2304_v47, %v2392_v27  ;;  %vm1202_vm13 = vcmp.lt.f32.partialorder %v2250_v5, 0.0  ;;  %v2781_v7 = vadd.f32 %v2637_v26, %v785_v43  ;;  %v2787_v17 = vpop.eup %1879  ;;  %v1472_v47 = vld [vmem:[%s3285_s6 + $0x8] sm:$0xff] }
 0x10c   : > { %v1008_v13 = vadd.f32 1.4214138, %v992_v28  ;;  %v991_v57 = vmul.f32 %v975_v18, %v2738_v20  ;;  %v974_v52 = vadd.f32 -1.4531521, %v958_v31  ;;  %v1074_v4 = vadd.f32 0.2548296, %v1058_v46 }
 0x10d   : > { %v1041_v48 = vadd.f32 -0.28449672, %v1025_v61  ;;  %v973_v16 = vadd.f32 -1.4531521, %v957_v36  ;;  %v2792_v27 = vsel %vm2671_vm7, %v2338_v25, %v850_v51  ;;  %v800_v40 = vmul.f32 %v2731_v44, %v799_v19  ;;  %v1473_v19 = vld [vmem:[%s3285_s6 + $0x10] sm:$0xff] }
 0x10e   : > { %v1024_v43 = vmul.f32 %v1008_v13, %v2716_v35  ;;  %v1007_v11 = vadd.f32 1.4214138, %v991_v57  ;;  %v990_v60 = vmul.f32 %v974_v52, %v2757_v45  ;;  %v1090_v42 = vmul.f32 %v1074_v4, %v2611_v3  ;;  %1492 = vmatpush.msrb.mxu3 %v1473_v19 }
 0x10f   : > { %v1057_v25 = vmul.f32 %v1041_v48, %v2651_v6  ;;  %v989_v50 = vmul.f32 %v973_v16, %v2762_v8  ;;  %v956_v29 = vmul.f32 1.0614054, %v2792_v27  ;;  %vm1201_vm4 = vcmp.lt.f32.partialorder %v2204_v39, 0.0 }
 0x110   : > { %v1040_v56 = vadd.f32 -0.28449672, %v1024_v43  ;;  %v1023_v24 = vmul.f32 %v1007_v11, %v2738_v20  ;;  %v1006_v32 = vadd.f32 1.4214138, %v990_v60  ;;  %vm1408_vm5 = vcmask 253952   ;;  %1493 = vmatpush.msrb.mxu3 %v1472_v47 }
 0x111   : > { %v1170_v28 = vmul.f32 %v2443_v55, %v1090_v42  ;;  %vm1274_vm6 = vcmask 130048   ;;  %v1073_v3 = vadd.f32 0.2548296, %v1057_v25  ;;  %v1005_v18 = vadd.f32 1.4214138, %v989_v50  ;;  %v1430_v25 = vpop.f32.mrf.mxu2 }
 0x112   : > { %v3437_v31 = vmov 0.0   ;;  %v835_v46 = vsel %vm2798_vm14, %v2261_v12, %v2353_v62  ;;  %vm817_vm15 = vweird.f32 %v2219_v49  ;;  %vm818_vm1 = vweird.f32 %v2241_v0 }
 0x113   : > { %1409 = vst.msk [vmem:[#allocation2] sm:$0x1] %vm1408_vm5, %v3437_v31  ;;  %v1056_v61 = vmul.f32 %v1040_v56, %v2716_v35  ;;  %v1039_v36 = vadd.f32 -0.28449672, %v1023_v24  ;;  %v1022_v55 = vmul.f32 %v1006_v32, %v2757_v45  ;;  %v972_v51 = vadd.f32 -1.4531521, %v956_v29 }
 0x114   : > { %vm1200_vm3 = vcmp.lt.f32.partialorder %v2428_v37, 0.0  ;;  %v2827_v13 = vadd.f32 %v2731_v44, %v800_v40  ;;  %v1186_v57 = vsub.f32 1.0, %v1170_v28  ;;  %v1089_v52 = vmul.f32 %v1073_v3, %v2651_v6  ;;  %v3441_v3 = vld [vmem:[#allocation17_spill] sm:$0xff] }
 0x115   : > { %v1021_v12 = vmul.f32 %v1005_v18, %v2762_v8  ;;  %v1072_v62 = vadd.f32 0.2548296, %v1056_v61  ;;  %v1055_v4 = vmul.f32 %v1039_v36, %v2738_v20  ;;  %v1038_v16 = vadd.f32 -0.28449672, %v1022_v55  ;;  %v1471_v36 = vld [vmem:[%s3285_s6] sm:$0xff] }
 0x116   : > { %vm1199_vm7 = vcmp.lt.f32.partialorder %v2343_v9, 0.0  ;;  %v1218_v40 = vsub.f32 0.0, %v1186_v57  ;;  %v1169_v43 = vmul.f32 %v2406_v23, %v1089_v52  ;;  %v2842_v6 = vsel %vm2766_vm12, %v2306_v59, %v835_v46  ;;  %1494 = vmatpush.msrb.mxu3 %v1471_v36  ;;  %v3463_v9 = vld [vmem:[#allocation21_spill] sm:$0xff] }
 0x117   : > { %v1037_v11 = vadd.f32 -0.28449672, %v1021_v12  ;;  %v1088_v60 = vmul.f32 %v1072_v62, %v2716_v35  ;;  %v1071_v42 = vadd.f32 0.2548296, %v1055_v4  ;;  %v988_v50 = vmul.f32 %v972_v51, %v2792_v27 }
 0x118   : > { %v1453_v1 = vpop.permute.xlu0 %1452  ;;  %v3438_v29 = vand.u32 2147483647, %v2219_v49  ;;  %v1234_v23 = vsel %vm1202_vm13, %v1218_v40, %v1186_v57  ;;  %v1185_v30 = vsub.f32 1.0, %v1169_v43  ;;  %v1054_v35 = vmul.f32 %v1038_v16, %v2757_v45 }
 0x119   : > { %v2832_v48 = vperm.slane %v1453_v1, 0  ;;  %vm1198_vm9 = vcmp.lt.f32.partialorder %v2302_v58, 0.0  ;;  %vm802_vm10 = vweird.f32 %v2631_v14  ;;  %vm803_vm0 = vweird.f32 %v2731_v44 }
 0x11a   : > { %vm2849_vm8 = vcmp.eq.f32.partialorder %v3438_v29, 8.507059e+37  ;;  %v1250_v24 = vadd.f32 1.0, %v1234_v23  ;;  %v1168_v32 = vmul.f32 %v2613_v38, %v1088_v60  ;;  %v1087_v19 = vmul.f32 %v1071_v42, %v2738_v20  ;;  %v1412_v5 = vld [vmem:[#allocation2] sm:$0x1]  ;;  %v3442_v38 = vld [vmem:[#allocation37_spill] sm:$0xff] }
 0x11b   : > { %1881 = vrcp.f32 %v2832_v48  ;;  %v1467_v59 = vand.u32 2147483648, %v2832_v48  ;;  %v1053_v28 = vmul.f32 %v1037_v11, %v2762_v8  ;;  %vm1197_vm2 = vcmp.lt.f32.partialorder %v3441_v3, 0.0  ;;  %v3448_v42 = vld [vmem:[#allocation31_spill] sm:$0xff] }
 0x11c   : > { %v1217_v18 = vsub.f32 0.0, %v1185_v30  ;;  %v1070_v46 = vadd.f32 0.2548296, %v1054_v35  ;;  %v1433_v61 = vadd.f32 %v1430_v25, %v1412_v5  ;;  %vm788_vm12 = vweird.f32 %v2637_v26  ;;  %v3449_v25 = vld [vmem:[#allocation40_spill] sm:$0xff]  ;;  %v3452_v35 = vld [vmem:[#allocation41_spill] sm:$0xff] }
 0x11d   : > { %v2864_v31 = vor.u32 1.1754944e-38, %v1467_v59  ;;  %v1266_v20 = vmul.f32 %v1250_v24, %v3442_v38  ;;  %v1184_v55 = vsub.f32 1.0, %v1168_v32  ;;  %v1167_v51 = vmul.f32 %v2522_v63, %v1087_v19  ;;  %v3453_v24 = vld [vmem:[#allocation46_spill] sm:$0xff] }
 0x11e   : > { %v1069_v57 = vadd.f32 0.2548296, %v1053_v28  ;;  %v1233_v52 = vsel %vm1201_vm4, %v1217_v18, %v1185_v30  ;;  %v1086_v1 = vmul.f32 %v1070_v46, %v2757_v45  ;;  %1435 = vst.msk [vmem:[#allocation2] sm:$0x1] %vm1408_vm5, %v1433_v61  ;;  %v1004_v12 = vadd.f32 1.4214138, %v988_v50  ;;  %vm2888_vm4 = vmor %vm817_vm15, %vm818_vm1 }
 0x11f   : > { %v955_v62 = vmul.f32 1.0614054, %v2842_v6  ;;  %1718 = vmatpush.xpose.msk.msra.mxu1 %vm1274_vm6, %v1266_v20  ;;  %v1249_v63 = vadd.f32 1.0, %v1233_v52  ;;  %v1216_v16 = vsub.f32 0.0, %v1184_v55  ;;  %v1183_v47 = vsub.f32 1.0, %v1167_v51  ;;  %v3450_v50 = vld [vmem:[#allocation26_spill] sm:$0xff] }
 0x120   : > { %v1085_v39 = vmul.f32 %v1069_v57, %v2762_v8  ;;  %vm2894_vm5 = vcmp.eq.f32.partialorder %v806_v10, 8.507059e+37  ;;  %v3447_v8 = vld [vmem:[#allocation51_spill] sm:$0xff]  ;;  %v1020_v60 = vmul.f32 %v1004_v12, %v2792_v27  ;;  %vm743_vm13 = vweird.f32 %v3453_v24  ;;  %v3457_v61 = vld [vmem:[#allocation57_spill] sm:$0xff]  ;;  %v3462_v52 = vld [vmem:[#allocation52_spill] sm:$0xff] }
 0x121   : > { %v2878_v4 = vpop.eup %1881  ;;  %v1166_v11 = vmul.f32 %v3447_v8, %v1086_v1  ;;  %v971_v49 = vadd.f32 -1.4531521, %v955_v62  ;;  %v1265_v29 = vmul.f32 %v1249_v63, %v3450_v50  ;;  %v1232_v10 = vsel %vm1200_vm3, %v1216_v16, %v1184_v55  ;;  %v3451_v30 = vld [vmem:[#allocation43_spill] sm:$0xff]  ;;  %v3464_v8 = vld [vmem:[#allocation16_spill] sm:$0xff]  ;;  %v3467_v45 = vld [vmem:[#allocation42_spill] sm:$0xff] }
 0x122   : > { %v1457_v43 = vmul.f32 %v2878_v4, %v2832_v48  ;;  %v1215_v23 = vsub.f32 0.0, %v1183_v47  ;;  %v1165_v59 = vmul.f32 %v3451_v30, %v1085_v39  ;;  %v3454_v32 = vand.u32 2147483647, %v2545_v22  ;;  %v3461_v51 = vld [vmem:[#allocation27_spill] sm:$0xff] }
 0x123   : > { %v1248_v28 = vadd.f32 1.0, %v1232_v10  ;;  %v1182_v18 = vsub.f32 1.0, %v1166_v11  ;;  %v1036_v46 = vadd.f32 -0.28449672, %v1020_v60  ;;  %v3458_v37 = vand.u32 2147483647, %v2526_v41  ;;  %1719 = vmatpush.xpose.msk.msra.mxu1 %vm1274_vm6, %v1265_v29 }
 0x124   : > { %vm2913_vm11 = vcmp.eq.f32.partialorder %v3454_v32, 8.507059e+37  ;;  %v1458_v5 = vsub.f32 1.0, %v1457_v43  ;;  %v1231_v38 = vsel %vm1199_vm7, %v1215_v23, %v1183_v47  ;;  %v1181_v20 = vsub.f32 1.0, %v1165_v59 }
 0x125   : > { %vm2921_vm1 = vcmp.eq.f32.partialorder %v3458_v37, 8.507059e+37  ;;  %v987_v55 = vmul.f32 %v971_v49, %v2842_v6  ;;  %v820_v57 = vsel %vm2888_vm4, %v2241_v0, %v3461_v51  ;;  %v1264_v1 = vmul.f32 %v1248_v28, %v3462_v52  ;;  %vm2946_vm4 = vmor %vm802_vm10, %vm803_vm0 }
 0x126   : > { %v1247_v12 = vadd.f32 1.0, %v1231_v38  ;;  %v1459_v62 = vmul.f32 %v2878_v4, %v1458_v5  ;;  %v1214_v63 = vsub.f32 0.0, %v1182_v18  ;;  %v1213_v16 = vsub.f32 0.0, %v1181_v20 }
 0x127   : > { %v1052_v39 = vmul.f32 %v1036_v46, %v2792_v27  ;;  %v1003_v43 = vadd.f32 1.4214138, %v987_v55  ;;  %v2939_v47 = vsel %vm2849_vm8, %v3463_v9, %v820_v57  ;;  %1720 = vmatpush.xpose.msk.msra.mxu1 %vm1274_vm6, %v1264_v1  ;;  %v3468_v23 = vand.u32 2147483647, %v3452_v35  ;;  %v3496_v9 = vld [vmem:[#allocation65_spill] sm:$0xff] }
 0x128   : > { %v1263_v11 = vmul.f32 %v1247_v12, %v3467_v45  ;;  %v1230_v60 = vsel %vm1198_vm9, %v1214_v63, %v1182_v18  ;;  %v954_v49 = vmul.f32 1.0614054, %v2939_v47  ;;  %v1460_v56 = vadd.f32 %v2878_v4, %v1459_v62  ;;  %v3477_v18 = vld [vmem:[#allocation39_spill] sm:$0xff]  ;;  %v3488_v63 = vld [vmem:[#allocation13_spill] sm:$0xff]  ;;  %v3498_v45 = vld [vmem:[#allocation24_spill] sm:$0xff] }
 0x129   : > { %v1246_v50 = vadd.f32 1.0, %v1230_v60  ;;  %v1229_v29 = vsel %vm1197_vm2, %v1213_v16, %v1181_v20  ;;  %v1068_v14 = vadd.f32 0.2548296, %v1052_v39  ;;  %v1019_v10 = vmul.f32 %v1003_v43, %v2842_v6  ;;  %v1449_v20 = vld [vmem:[#allocation2] sm:$0x1] }
 0x12a   : > { %vm2961_vm8 = vcmp.eq.f32.partialorder %v3468_v23, 8.507059e+37  ;;  %v3471_v58 = vand.u32 2147483647, %v3457_v61  ;;  %vm3474_vm10 = vweird.f32 %v2545_v22  ;;  %v1245_v32 = vadd.f32 1.0, %v1229_v29 }
 0x12b   : > { %vm2975_vm0 = vmor %vm3474_vm10, %vm788_vm12  ;;  %v970_v28 = vadd.f32 -1.4531521, %v954_v49  ;;  %vm1462_vm2 = vweird.f32 %v2878_v4  ;;  %v1465_v5 = vand.u32 2147483647, %v2832_v48  ;;  %v1262_v46 = vmul.f32 %v1246_v50, %v3477_v18  ;;  %1721 = vmatpush.xpose.msk.msra.mxu1 %vm1274_vm6, %v1263_v11  ;;  %v3505_v50 = vld [vmem:[#allocation56_spill] sm:$0xff] }
 0x12c   : > { %vm2967_vm9 = vcmp.eq.f32.partialorder %v3471_v58, 8.507059e+37  ;;  %v1084_v37 = vmul.f32 %v1068_v14, %v2792_v27  ;;  %v1035_v38 = vadd.f32 -0.28449672, %v1019_v10  ;;  %vm3478_vm7 = vweird.f32 %v2832_v48  ;;  %v3486_v48 = vld [vmem:[#allocation29_spill] sm:$0xff] }
 0x12d   : > { %vm1463_vm15 = vmor %vm3478_vm7, %vm1462_vm2  ;;  %v805_v22 = vsel %vm2946_vm4, %v2731_v44, %v2827_v13  ;;  %v3479_v55 = vand.u32 2147483647, %v3448_v42  ;;  %vm3482_vm10 = vweird.f32 %v2605_v54  ;;  %vm3483_vm3 = vweird.f32 %v2526_v41  ;;  %v3487_v13 = vld [vmem:[#allocation34_spill] sm:$0xff]  ;;  %v3506_v58 = vld [vmem:[#allocation61_spill] sm:$0xff] }
 0x12e   : > { %vm2999_vm14 = vmor %vm3483_vm3, %vm3482_vm10  ;;  %v1261_v57 = vmul.f32 %v1245_v32, %v3486_v48  ;;  %v986_v52 = vmul.f32 %v970_v28, %v2939_v47  ;;  %v1464_v44 = vsel %vm1463_vm15, %v2878_v4, %v1460_v56  ;;  %vm1466_vm7 = vcmp.eq.f32.partialorder %v1465_v5, 8.507059e+37  ;;  %v3515_v48 = vld [vmem:[#allocation25_spill] sm:$0xff]  ;;  %v3516_v4 = vld [vmem:[#allocation48_spill] sm:$0xff] }
 0x12f   : > { %vm2991_vm12 = vcmp.eq.f32.partialorder %v3479_v55, 8.507059e+37  ;;  %v1164_v1 = vmul.f32 %v3487_v13, %v1084_v37  ;;  %v1051_v12 = vmul.f32 %v1035_v38, %v2842_v6  ;;  %v1469_v62 = vsel %vm1466_vm7, %v2864_v31, %v1464_v44  ;;  %1722 = vmatpush.xpose.msk.msra.mxu1 %vm1274_vm6, %v1262_v46  ;;  %v3509_v38 = vld [vmem:[#allocation12_spill] sm:$0xff]  ;;  %v3514_v55 = vld [vmem:[#allocation54_spill] sm:$0xff] }
 0x130   : > { %v3013_v41 = vsel %vm2894_vm5, %v2711_v53, %v805_v22  ;;  %vm1195_vm3 = vcmp.lt.f32.partialorder %v3488_v63, 0.0  ;;  %vm3489_vm4 = vweird.f32 %v3449_v25  ;;  %vm3490_vm15 = vweird.f32 %v3448_v42  ;;  %v3520_v63 = vld [vmem:[#allocation58_spill] sm:$0xff] }
 0x131   : > { %vm3020_vm2 = vmor %vm3490_vm15, %vm3489_vm4  ;;  %v1002_v16 = vadd.f32 1.4214138, %v986_v52  ;;  %v1470_v39 = vmul.f32 %v1469_v62, %v1449_v20  ;;  %v953_v43 = vmul.f32 1.0614054, %v3013_v41  ;;  %v790_v53 = vsel %vm2975_vm0, %v2637_v26, %v2781_v7  ;;  %v3497_v7 = vld [vmem:[#allocation18_spill] sm:$0xff] }
 0x132   : > { %vm3493_vm5 = vweird.f32 %v3452_v35  ;;  %v1180_v40 = vsub.f32 1.0, %v1164_v1  ;;  %v1067_v42 = vadd.f32 0.2548296, %v1051_v12  ;;  %v3040_v0 = vsel %vm2913_vm11, %v3496_v9, %v790_v53  ;;  %v3517_v9 = vld [vmem:[#allocation28_spill] sm:$0xff] }
 0x133   : > { %vm3033_vm10 = vmor %vm3493_vm5, %vm743_vm13  ;;  %v775_v26 = vsel %vm2999_vm14, %v2605_v54, %v2706_v15  ;;  %vm712_vm0 = vweird.f32 %v3497_v7  ;;  %vm713_vm7 = vweird.f32 %v3498_v45  ;;  %vm3499_vm13 = vweird.f32 %v2558_v21  ;;  %v3504_v54 = vld [vmem:[#allocation64_spill] sm:$0xff]  ;;  %1723 = vmatpush.xpose.msk.msra.mxu1 %vm1274_vm6, %v1261_v57 }
 0x134   : > { %vm3500_vm4 = vweird.f32 %v3457_v61  ;;  %v1018_v19 = vmul.f32 %v1002_v16, %v2939_v47  ;;  %vm3503_vm11 = vcmask 261120   ;;  %v969_v11 = vadd.f32 -1.4531521, %v953_v43 }
 0x135   : > { %vm3052_vm15 = vmor %vm3500_vm4, %vm3499_vm13  ;;  %1735 = vmatmul.msk.f32.vlgmr.msrb.gmra.mxu3 %vm3503_vm11, %v1470_v39  ;;  %v952_v60 = vmul.f32 1.0614054, %v3040_v0  ;;  %v3062_v15 = vsel %vm2921_vm1, %v3504_v54, %v775_v26  ;;  %v1212_v49 = vsub.f32 0.0, %v1180_v40  ;;  %v1083_v61 = vmul.f32 %v1067_v42, %v2842_v6  ;;  %v3508_v6 = vld [vmem:[#allocation30_spill] sm:$0xff] }
 0x136   : > { %v951_v56 = vmul.f32 1.0614054, %v3062_v15  ;;  %v730_v29 = vsel %vm3020_vm2, %v3449_v25, %v3505_v50  ;;  %v1034_v14 = vadd.f32 -0.28449672, %v1018_v19  ;;  %v985_v10 = vmul.f32 %v969_v11, %v3013_v41 }
 0x137   : > { %v968_v23 = vadd.f32 -1.4531521, %v952_v60  ;;  %v745_v36 = vsel %vm3033_vm10, %v3453_v24, %v3506_v58  ;;  %vm3507_vm14 = vcmp.lt.f32.partialorder %v3464_v8, 0.0  ;;  %v1163_v32 = vmul.f32 %v3508_v6, %v1083_v61  ;;  %v3521_v61 = vld [vmem:[#allocation22_spill] sm:$0xff] }
 0x138   : > { %v1228_v3 = vsel %vm3507_vm14, %v1212_v49, %v1180_v40  ;;  %v967_v28 = vadd.f32 -1.4531521, %v951_v56  ;;  %v760_v25 = vsel %vm3052_vm15, %v2558_v21, %v2703_v2  ;;  %v1050_v18 = vmul.f32 %v1034_v14, %v2939_v47  ;;  %v3513_v21 = vld [vmem:[#allocation62_spill] sm:$0xff] }
 0x139   : > { %v1244_v5 = vadd.f32 1.0, %v1228_v3  ;;  %v1001_v46 = vadd.f32 1.4214138, %v985_v10  ;;  %v984_v37 = vmul.f32 %v968_v23, %v3040_v0  ;;  %vm1194_vm1 = vcmp.lt.f32.partialorder %v3509_v38, 0.0 }
 0x13a   : > { %v3510_v24 = vand.u32 2147483647, %v3497_v7  ;;  %v1179_v20 = vsub.f32 1.0, %v1163_v32  ;;  %v983_v22 = vmul.f32 %v967_v28, %v3062_v15  ;;  %v3097_v2 = vsel %vm2967_vm9, %v3513_v21, %v760_v25  ;;  %v3522_v32 = vld [vmem:[#allocation33_spill] sm:$0xff]  ;;  %v3523_v25 = vld [vmem:[#allocation50_spill] sm:$0xff] }
 0x13b   : > { %v3102_v27 = vsel %vm2961_vm8, %v3514_v55, %v745_v36  ;;  %v1260_v52 = vmul.f32 %v1244_v5, %v3515_v48  ;;  %v1066_v44 = vadd.f32 0.2548296, %v1050_v18  ;;  %v1017_v13 = vmul.f32 %v1001_v46, %v3013_v41  ;;  %vm3126_vm8 = vmor %vm712_vm0, %vm713_vm7 }
 0x13c   : > { %vm3088_vm2 = vcmp.eq.f32.partialorder %v3510_v24, 8.507059e+37  ;;  %v1000_v1 = vadd.f32 1.4214138, %v984_v37  ;;  %v1211_v57 = vsub.f32 0.0, %v1179_v20  ;;  %v999_v12 = vadd.f32 1.4214138, %v983_v22 }
 0x13d   : > { %v950_v62 = vmul.f32 1.0614054, %v3097_v2  ;;  %v3110_v59 = vsel %vm2991_vm12, %v3516_v4, %v730_v29  ;;  %v1082_v16 = vmul.f32 %v1066_v44, %v2939_v47  ;;  %v1033_v30 = vadd.f32 -0.28449672, %v1017_v13  ;;  %1724 = vmatpush.xpose.msk.msra.mxu1 %vm1274_vm6, %v1260_v52  ;;  %v3524_v22 = vld [vmem:[#allocation36_spill] sm:$0xff] }
 0x13e   : > { %v1016_v39 = vmul.f32 %v1000_v1, %v3040_v0  ;;  %v949_v43 = vmul.f32 1.0614054, %v3102_v27  ;;  %v1227_v53 = vsel %vm1195_vm3, %v1211_v57, %v1179_v20  ;;  %v1015_v31 = vmul.f32 %v999_v12, %v3062_v15  ;;  %v3525_v1 = vld [vmem:[#allocation20_spill] sm:$0xff] }
 0x13f   : > { %v966_v40 = vadd.f32 -1.4531521, %v950_v62  ;;  %v948_v42 = vmul.f32 1.0614054, %v3110_v59  ;;  %v1243_v51 = vadd.f32 1.0, %v1227_v53  ;;  %v1162_v26 = vmul.f32 %v3517_v9, %v1082_v16 }
 0x140   : > { %v1049_v47 = vmul.f32 %v1033_v30, %v3013_v41  ;;  %v1032_v35 = vadd.f32 -0.28449672, %v1016_v39  ;;  %vm1193_vm9 = vcmp.lt.f32.partialorder %v3520_v63, 0.0  ;;  %v1031_v11 = vadd.f32 -0.28449672, %v1015_v31  ;;  %v3526_v30 = vld [vmem:[#allocation55_spill] sm:$0xff] }
 0x141   : > { %v982_v60 = vmul.f32 %v966_v40, %v3097_v2  ;;  %v965_v54 = vadd.f32 -1.4531521, %v949_v43  ;;  %v964_v49 = vadd.f32 -1.4531521, %v948_v42  ;;  %v1259_v56 = vmul.f32 %v1243_v51, %v3521_v61  ;;  %v1268_v42 = vld [vmem:[%s3284_s5] sm:$0xff] }
 0x142   : > { %v1178_v50 = vsub.f32 1.0, %v1162_v26  ;;  %v1065_v29 = vadd.f32 0.2548296, %v1049_v47  ;;  %v1048_v14 = vmul.f32 %v1032_v35, %v3040_v0  ;;  %v1047_v10 = vmul.f32 %v1031_v11, %v3062_v15  ;;  %v1500_v51 = vld [vmem:[%s3287_s8] sm:$0xff]  ;;  %1271 = vperm.xlu1 %1816, %v1268_v42  }
 0x143   : > { %v998_v7 = vadd.f32 1.4214138, %v982_v60  ;;  %v981_v23 = vmul.f32 %v965_v54, %v3102_v27  ;;  %v980_v58 = vmul.f32 %v964_v49, %v3110_v59  ;;  %1725 = vmatpush.xpose.msk.msra.mxu1 %vm1274_vm6, %v1259_v56  ;;  %v715_v28 = vsel %vm3126_vm8, %v3498_v45, %v3522_v32  ;;  %1521 = vmatpush.msra.mxu3 %v1500_v51  ;;  %v3527_v60 = vld [vmem:[#allocation49_spill] sm:$0xff]  ;;  %v3528_v49 = vld [vmem:[#allocation60_spill] sm:$0xff] }
 0x144   : > { %v1210_v36 = vsub.f32 0.0, %v1178_v50  ;;  %v1081_v3 = vmul.f32 %v1065_v29, %v3013_v41  ;;  %v1064_v6 = vadd.f32 0.2548296, %v1048_v14  ;;  %vm1191_vm12 = vcmp.lt.f32.partialorder %v3523_v25, 0.0  ;;  %v3533_v32 = vld [vmem:[#allocation53_spill] sm:$0xff] }
 0x145   : > { %v1063_v5 = vadd.f32 0.2548296, %v1047_v10  ;;  %v1014_v18 = vmul.f32 %v998_v7, %v3097_v2  ;;  %v997_v46 = vadd.f32 1.4214138, %v981_v23  ;;  %v996_v37 = vadd.f32 1.4214138, %v980_v58 }
 0x146   : > { %v1226_v24 = vsel %vm1194_vm1, %v1210_v36, %v1178_v50  ;;  %v1161_v20 = vmul.f32 %v2787_v17, %v1081_v3  ;;  %v1080_v41 = vmul.f32 %v1064_v6, %v3040_v0  ;;  %v3152_v21 = vsel %vm3088_vm2, %v3524_v22, %v715_v28  ;;  %v3529_v50 = vld [vmem:[#allocation63_spill] sm:$0xff]  ;;  %v3530_v23 = vld [vmem:[#allocation38_spill] sm:$0xff]  ;;  %v3534_v25 = vld [vmem:[#allocation45_spill] sm:$0xff] }
 0x147   : > { %v1242_v45 = vadd.f32 1.0, %v1226_v24  ;;  %v1079_v55 = vmul.f32 %v1063_v5, %v3062_v15  ;;  %v1030_v48 = vadd.f32 -0.28449672, %v1014_v18  ;;  %v1013_v52 = vmul.f32 %v997_v46, %v3102_v27  ;;  %v3531_v36 = vld [vmem:[#allocation47_spill] sm:$0xff] }
 0x148   : > { %v1177_v44 = vsub.f32 1.0, %v1161_v20  ;;  %v1160_v13 = vmul.f32 %v2740_v34, %v1080_v41  ;;  %v1012_v38 = vmul.f32 %v996_v37, %v3110_v59  ;;  %v947_v17 = vmul.f32 1.0614054, %v3152_v21  ;;  %v3532_v3 = vld [vmem:[#allocation59_spill] sm:$0xff] }
 0x149   : > { %v1258_v0 = vmul.f32 %v1242_v45, %v3525_v1  ;;  %v1159_v57 = vmul.f32 %v2709_v33, %v1079_v55  ;;  %v1046_v8 = vmul.f32 %v1030_v48, %v3097_v2  ;;  %v1029_v12 = vadd.f32 -0.28449672, %v1013_v52  ;;  %v3535_v41 = vld [vmem:[#allocation35_spill] sm:$0xff]  ;;  %v3536_v52 = vld [vmem:[#allocation44_spill] sm:$0xff] }
 0x14a   : > { %v1209_v62 = vsub.f32 0.0, %v1177_v44  ;;  %v1176_v4 = vsub.f32 1.0, %v1160_v13  ;;  %v1028_v15 = vadd.f32 -0.28449672, %v1012_v38  ;;  %v963_v16 = vadd.f32 -1.4531521, %v947_v17 }
 0x14b   : > { %vm1192_vm3 = vcmp.lt.f32.partialorder %v3526_v30, 0.0  ;;  %1726 = vmatpush.xpose.msk.msra.mxu1 %vm1274_vm6, %v1258_v0  ;;  %v1175_v34 = vsub.f32 1.0, %v1159_v57  ;;  %v1062_v39 = vadd.f32 0.2548296, %v1046_v8  ;;  %v1045_v43 = vmul.f32 %v1029_v12, %v3102_v27  ;;  %v3537_v57 = vld [vmem:[#allocation23_spill] sm:$0xff]  ;;  %v3538_v12 = vld [vmem:[#allocation32_spill] sm:$0xff] }
 0x14c   : > { %v1225_v53 = vsel %vm1193_vm9, %v1209_v62, %v1177_v44  ;;  %v1208_v31 = vsub.f32 0.0, %v1176_v4  ;;  %v1044_v33 = vmul.f32 %v1028_v15, %v3110_v59  ;;  %v979_v40 = vmul.f32 %v963_v16, %v3152_v21 }
 0x14d   : > { %v1241_v9 = vadd.f32 1.0, %v1225_v53  ;;  %v1207_v26 = vsub.f32 0.0, %v1175_v34  ;;  %v1078_v47 = vmul.f32 %v1062_v39, %v3097_v2  ;;  %v1061_v35 = vadd.f32 0.2548296, %v1045_v43  ;;  %v3540_v43 = vld [vmem:[#allocation19_spill] sm:$0xff] }
 0x14e   : > { %v1224_v19 = vsel %vm1192_vm3, %v1208_v31, %v1176_v4  ;;  %v1060_v63 = vadd.f32 0.2548296, %v1044_v33  ;;  %v995_v11 = vadd.f32 1.4214138, %v979_v40  ;;  %v632_v54 = vmul.f32 0.5, %v3527_v60  ;;  %v3541_v40 = vld [vmem:[#allocation14_spill] sm:$0xff] }
 0x14f   : > { %v1257_v61 = vmul.f32 %v1241_v9, %v3528_v49  ;;  %v1240_v56 = vadd.f32 1.0, %v1224_v19  ;;  %v1158_v29 = vmul.f32 %v3529_v50, %v1078_v47  ;;  %v1223_v14 = vsel %vm1191_vm12, %v1207_v26, %v1175_v34  ;;  %v3539_v34 = vld [vmem:[#allocation15_spill] sm:$0xff] }
 0x150   : > { %v1077_v2 = vmul.f32 %v1061_v35, %v3102_v27  ;;  %v1076_v10 = vmul.f32 %v1060_v63, %v3110_v59  ;;  %v1011_v7 = vmul.f32 %v995_v11, %v3152_v21  ;;  %1883 = vpow2.f32 %v3530_v23  ;;  %v1267_v47 = vld [vmem:[%s3283_s4] sm:$0xff] }
 0x151   : > { %1727 = vmatpush.xpose.msk.msra.mxu1 %vm1274_vm6, %v1257_v61  ;;  %v1174_v58 = vsub.f32 1.0, %v1158_v29  ;;  %vm1190_vm5 = vcmp.lt.f32.partialorder %v3531_v36, 0.0  ;;  %v631_v18 = vmul.f32 0.5, %v3534_v25  ;;  %v1256_v46 = vmul.f32 %v1240_v56, %v632_v54  ;;  %v1475_v35 = vld [vmem:[%s3286_s7] sm:$0x1] }
 0x152   : > { %v1157_v6 = vmul.f32 %v3532_v3, %v1077_v2  ;;  %v1156_v28 = vmul.f32 %v3533_v32, %v1076_v10  ;;  %v1027_v5 = vadd.f32 -0.28449672, %v1011_v7  ;;  %v1239_v27 = vadd.f32 1.0, %v1223_v14 }
 0x153   : > { %v1206_v37 = vsub.f32 0.0, %v1174_v58  ;;  %vm1189_vm10 = vcmp.lt.f32.partialorder %v3535_v41, 0.0  ;;  %v630_v44 = vmul.f32 0.5, %v3536_v52  ;;  %vm1188_vm0 = vcmp.lt.f32.partialorder %v3537_v57, 0.0 }
 0x154   : > { %v1173_v59 = vsub.f32 1.0, %v1157_v6  ;;  %v1172_v24 = vsub.f32 1.0, %v1156_v28  ;;  %v1043_v20 = vmul.f32 %v1027_v5, %v3152_v21  ;;  %v1255_v13 = vmul.f32 %v1239_v27, %v631_v18 }
 0x155   : > { %1728 = vmatpush.xpose.msk.msra.mxu1 %vm1274_vm6, %v1256_v46  ;;  %v1222_v22 = vsel %vm1190_vm5, %v1206_v37, %v1174_v58  ;;  %v629_v62 = vmul.f32 0.5, %v3538_v12  ;;  %vm1187_vm7 = vcmp.lt.f32.partialorder %v3539_v34, 0.0  ;;  %v628_v53 = vmul.f32 0.5, %v3540_v43 }
 0x156   : > { %v1205_v45 = vsub.f32 0.0, %v1173_v59  ;;  %v1059_v55 = vadd.f32 0.2548296, %v1043_v20  ;;  %v1884_v48 = vpop.eup %1883  ;;  %v1238_v38 = vadd.f32 1.0, %v1222_v22  ;;  %v1204_v1 = vsub.f32 0.0, %v1172_v24 }
 0x157   : > { %v627_v42 = vmul.f32 0.5, %v3541_v40  ;;  %vm1502_vm13 = vcmask 64512   ;;  %vm1377_vm4 = vcmask 1045504   ;;  %v1385_v3 = vlaneseq }
 0x158   : > { %v1221_v17 = vsel %vm1189_vm10, %v1205_v45, %v1173_v59  ;;  %v1075_v0 = vmul.f32 %v1059_v55, %v3152_v21  ;;  %v1254_v4 = vmul.f32 %v1238_v38, %v630_v44  ;;  %v1220_v16 = vsel %vm1188_vm0, %v1204_v1, %v1172_v24 }
 0x159   : > { %1729 = vmatpush.xpose.msk.msra.mxu1 %vm1274_vm6, %v1255_v13  ;;  %v1237_v15 = vadd.f32 1.0, %v1221_v17  ;;  %v1236_v21 = vadd.f32 1.0, %v1220_v16  ;;  %v1386_v28 = vshrl.u32 %v1385_v3, 7 }
 0x15a   : > { %v1155_v8 = vmul.f32 %v1884_v48, %v1075_v0 }
 0x15b   : > { %v1253_v31 = vmul.f32 %v1237_v15, %v629_v62  ;;  %v1252_v51 = vmul.f32 %v1236_v21, %v628_v53  ;;  %v1387_v18 = vcvt.s32.f32 %v1386_v28 }
 0x15c   : > { %v1171_v30 = vsub.f32 1.0, %v1155_v8 }
 0x15d   : > { %1730 = vmatpush.xpose.msk.msra.mxu1 %vm1274_vm6, %v1254_v4 }
 0x15e   : > { %v1203_v39 = vsub.f32 0.0, %v1171_v30 }
 0x160   : > { %v1219_v33 = vsel %vm1187_vm7, %v1203_v39, %v1171_v30 }
 0x161   : > { %1731 = vmatpush.xpose.msk.msra.mxu1 %vm1274_vm6, %v1253_v31  ;;  %v1235_v9 = vadd.f32 1.0, %v1219_v33 }
 0x163   : > { %v1251_v26 = vmul.f32 %v1235_v9, %v627_v42 }
 0x165   : > { %1732 = vmatpush.xpose.msk.msra.mxu1 %vm1274_vm6, %v1252_v51 }
 0x169   : > { %1733 = vmatpush.xpose.msk.msra.mxu1 %vm1274_vm6, %v1251_v26 }
 0x16c   : > { %1734 = vmatmul.msk.f32.vlgmr.msra.gmra.mxu1 %vm1274_vm6, %v1267_v47 }
 0x1b4   : > { %v1272_v60 = vpop.permute.xlu1 %1271 }
 0x1b8   : > { %v1496_v19 = vpop.f32.mrf.mxu3 }
 0x1b9   : > { %v1497_v63 = vadd.f32 %v1496_v19, %v1475_v35 }
 0x1bb   : > { %v1499_v11 = vmax.f32 %v1497_v63, 0.0 }
 0x1bd   : > { %1736 = vmatmul.msk.f32.vlgmr.msra.gmra.mxu3 %vm1502_vm13, %v1499_v11 }
 0x1e9   : > { %v1343_v54 = vpop.f32.mrf.mxu1 }
 0x1ea   : > { %v1344_v49 = vadd.f32 %v1343_v54, %v1272_v60 }
 0x1ec   : > { %v1346_v61 = vrot.slane %v1344_v49, 4  ;;  %v1378_v56 = vsel %vm1377_vm4, %v1344_v49, -inf }
 0x1ed   : > { %v1379_v29 = vrot.slane %v1378_v56, 4 }
 0x1ee   : > { %v1347_v50 = vmax.f32 %v1344_v49, %v1346_v61 }
 0x1ef   : > { %v1380_v2 = vmax.f32 %v1378_v56, %v1379_v29 }
 0x1f0   : > { %v1348_v14 = vrot.slane %v1347_v50, 2 }
 0x1f1   : > { %v1381_v7 = vrot.slane %v1380_v2, 2 }
 0x1f2   : > { %v1349_v10 = vmax.f32 %v1347_v50, %v1348_v14 }
 0x1f3   : > { %v1382_v58 = vmax.f32 %v1380_v2, %v1381_v7 }
 0x1f4   : > { %v1350_v23 = vrot.slane %v1349_v10, 1 }
 0x1f5   : > { %v1383_v6 = vrot.slane %v1382_v58, 1 }
 0x1f6   : > { %v1351_v36 = vmax.f32 %v1349_v10, %v1350_v23 }
 0x1f7   : > { %v1384_v5 = vmax.f32 %v1382_v58, %v1383_v6 }
 0x1f8   : > { %v1352_v32 = vsub.f32 %v1344_v49, %v1351_v36 }
 0x1f9   : > { %vm1388_vm6 = vcmp.ge.f32.partialorder %v1344_v49, %v1384_v5 }
 0x1fa   : > { %v1353_v25 = vmul.f32 1.442695, %v1352_v32  ;;  %v1389_v46 = vsel %vm1388_vm6, %v1387_v18, 6.0 }
 0x1fb   : > { %v1390_v27 = vsel %vm1377_vm4, %v1389_v46, inf }
 0x1fc   : > { %1885 = vpow2.f32 %v1353_v25  ;;  %v1391_v59 = vrot.slane %v1390_v27, 4 }
 0x1fe   : > { %v1392_v20 = vmin.f32 %v1390_v27, %v1391_v59 }
 0x200   : > { %v1393_v45 = vrot.slane %v1392_v20, 2 }
 0x202   : > { %v1886_v37 = vpop.eup %1885  ;;  %v1394_v48 = vmin.f32 %v1392_v20, %v1393_v45 }
 0x203   : > { %v1355_v24 = vrot.slane %v1886_v37, 4 }
 0x204   : > { %v1395_v44 = vrot.slane %v1394_v48, 1 }
 0x205   : > { %v1356_v41 = vadd.f32 %v1886_v37, %v1355_v24 }
 0x206   : > { %v1396_v38 = vmin.f32 %v1394_v48, %v1395_v44 }
 0x207   : > { %v1357_v22 = vrot.slane %v1356_v41, 2 }
 0x208   : > { %vm1748_vm15 = vcmp.lt.s32.totalorder %v1396_v38, 0  ;;  %v1749_v17 = vceil.f32 %v1396_v38  ;;  %v1750_v1 = vfloor.f32 %v1396_v38 }
 0x209   : > { %v1358_v55 = vadd.f32 %v1357_v22, %v1356_v41 }
 0x20a   : > { %v1751_v0 = vsel %vm1748_vm15, %v1749_v17, %v1750_v1 }
 0x20b   : > { %v1359_v52 = vrot.slane %v1358_v55, 1  ;;  %v1752_v57 = vcvt.f32.s32 %v1751_v0 }
 0x20d   : > { %v1360_v13 = vadd.f32 %v1359_v52, %v1358_v55  ;;  %1403 = vst [vmem:[%s463_s22] sm:$0x1] %v1752_v57 }
 0x20f   : > { %1887 = vrcp.f32 %v1360_v13 }
 0x215   : > { %v1888_v8 = vpop.eup %1887 }
 0x216   : > { %v1362_v12 = vmul.f32 %v1888_v8, %v1360_v13 }
 0x217   : > { %1916 = shalt.err (!%p1913_p5)
}
 0x218   : > { %1754 = dma.vmem_to_hbm [thread:$0]  (%p2111_p4), %s1561_s9, 16, %s1563_s30, %s1532_s13   ;;  %v1372_v62 = vand.u32 2147483648, %v1360_v13  ;;  %v1363_v4 = vsub.f32 1.0, %v1362_v12  ;;  %vm1366_vm11 = vweird.f32 %v1360_v13  ;;  %vm1367_vm14 = vweird.f32 %v1888_v8  ;;  %v1817_v53 = vld [vmem:[%s2146_s20] ss:$0 sm:$0xff] }
 0x219   : > { %v1370_v15 = vand.u32 2147483647, %v1360_v13  ;;  %vm1368_vm1 = vmor %vm1366_vm11, %vm1367_vm14  ;;  %s1544_s2 = scalar_lea.hbm %s3289_s10, %s1991_s26  ;;  %v1501_v31 = vld [vmem:[#allocation4] sm:$0x1]  ;;  %s457_s3 = scalar_lea.vmem [#allocation5], %s3217_s15  ;;  %vm3542_vm8 = vcmask 0  }
 0x21a   : > { %v1364_v16 = vmul.f32 %v1888_v8, %v1363_v4  ;;  %v1373_v30 = vor.u32 1.1754944e-38, %v1372_v62  ;;  %s1546_s22 = sshll.u32 %s457_s3, 4  ;;  %s1548_s9 = sshll.u32 %s1544_s2, 4  ;;  %s1547_s22 = int_to_ptr.vmem [resolvable:$true] %s1546_s22  ;;  %s1549_s9 = int_to_ptr.hbm [resolvable:$true] %s1548_s9 }
 0x21b   : > { %vm1371_vm2 = vcmp.eq.f32.partialorder %v1370_v15, 8.507059e+37  ;;  %s487_s18 = scalar_lea.vmem %s3291_s12, %s2137_s29  ;;  %s1528_s26 = scalar_lea.sflag [#allocation6], %s3217_s15 }
 0x21c   : > { %v1365_v34 = vadd.f32 %v1888_v8, %v1364_v16  ;;  %s1931_s20 = sshra.s32 %s1549_s9, 4  ;;  %s1937_s29 = scalar_lea.hbm %s3289_s10, 2  ;;  %s1932_s20 = int_to_ptr.hbm [resolvable:$true] %s1931_s20 }
 0x21d   : > { %s1933_s19 = scalar_lea.hbm %s1932_s20, 1  ;;  %p1938_p10 = scmp.lt.s32.totalorder %s1932_s20, %s3289_s10 }
 0x21e   : > { %v1369_v39 = vsel %vm1368_vm1, %v1888_v8, %v1365_v34  ;;  %p1934_p6 = scmp.ne.s32.totalorder %s1932_s20, %s1933_s19  ;;  %p1939_p11 = scmp.lt.s32.totalorder %s1937_s29, %s1933_s19 }
 0x21f   : > { %v1374_v43 = vsel %vm1371_vm2, %v1373_v30, %v1369_v39 }
 0x220   : > { %v1375_v21 = vmul.f32 %v1886_v37, %v1374_v43  ;;  %p1935_p7 = pnand %p1934_p6, %p2111_p4  ;;  %p1940_p12 = por %p1939_p11, %p1938_p10 }
 0x222   : > { %v1376_v40 = vsub.f32 1.0, %v1375_v21  ;;  %p1936_p9 = pneg %p1935_p7 }
 0x224   : > { %v1400_v51 = vmul.f32 %v1817_v53, %v1376_v40  ;;  %p1941_p13 = pnand %p1940_p12, %p1936_p9 }
 0x226   : > { %1401 = vst [vmem:[%s457_s3 - $0x6] sm:$0x40] %v1400_v51 }
 0x240   : > { %v1523_v33 = vpop.f32.mrf.mxu3 }
 0x241   : > { %v1524_v42 = vadd.f32 %v1523_v33, %v1501_v31 }
 0x243   : > { %1526 = vst.msk [vmem:[%s487_s18] sm:$0x1] %vm3542_vm8, %v1524_v42 }
 0x244   : > { %1944 = shalt.err (!%p1941_p13)
}
 0x245   : > { %1753 = dma.vmem_to_hbm [thread:$0]  (%p2111_p4), %s1547_s22, 16, %s1549_s9, %s1528_s26  }
 0x246 PF: > { %p1764_p0 = scmp.ge.s32.totalorder %s1999_s28, 2  ;;  %s1577_s15 = sand.u32 1, %s1979_s23  }
 0x247   : > { %s1578_s3 = scalar_lea.sflag [#allocation6], %s1577_s15 }
 0x248   : > { %p1758_p1 = pnand %p1764_p0, %p2118_p8 }
 0x24a   : > { %p1759_p2 = pneg %p1758_p1 }
 0x24c   : > { %1970 = dma.done.wait (%p1759_p2), %s1578_s3, 16  }
 0x24d   : > { %1972 = vsyncadd (%p1759_p2), %s1578_s3, 4294967280  ;;  %s1587_s30 = scalar_lea.sflag [#allocation8], %s1577_s15 }
 0x24e   : > { %1974 = dma.done.wait (%p1759_p2), %s1587_s30, 16  }
 0x24f   : > { %1976 = vsyncadd (%p1759_p2), %s1587_s30, 4294967280  ;;  %s31_s28 = sadd.s32 1, %s1999_s28   ;;  %s3543_s14 = sld [smem:[#allocation11_spill]] }
 0x250   : > { %p28_p3 = scmp.ge.s32.totalorder %s31_s28, 4   ;;  %s3544_s23 = smov %s1983_s24 }
 0x251   : > { %s3545_s24 = smov %s1987_s25  ;;  %s3546_s25 = smov %s2124_s17 }
 0x252   : > { %s3547_s26 = smov %s1995_s27  ;;  %30 = sbr.rel (!%p28_p3) target bundleno = 11 (0xb), region = 135 }
 0x255   : > { %s3548_s27 = smov %s3543_s14 }
 0x257   :  { %1598 = vsyncpa [#allocation6], 1 }
 0x258   :  { %1600 = vsyncpa [#allocation6 + $0x1], 1 }
 0x259   :  { %1601 = vsyncpa [#allocation8], 1 }
 0x25a   :  { %1603 = vsyncpa [#allocation8 + $0x1], 1 }

</bundles_post_ra>
